<compile_context>
chip_gen: v5e
topology: v5e:2x2
jax: 0.10.0
libtpu: 0.0.40
codegen_flags: <defaults>
</compile_context>

<pallas_src>
import functools

import jax
import jax.numpy as jnp
from jax.experimental import pallas as pl
from jax.experimental.pallas import tpu as pltpu


# ----------------------------------------------------------------------------
# helpers
# ----------------------------------------------------------------------------
def _round_up(x, m):
    return (x + m - 1) // m * m


# ----------------------------------------------------------------------------
# Fused Pallas kernel: (folded encoder+adapter-1) -> ReLU -> adapter-2 -> LM head
# ----------------------------------------------------------------------------
def _slam_speech_kernel(x_ref, wc_ref, b1_ref, w2_ref, b2_ref,
                        wlm_ref, blm_ref, *refs, return_embed):
    # x_ref : (tm, K*frame_dim) f32  -- K consecutive raw frames per output row
    # wc    : (K*frame_dim, hidden)  bf16   (w_enc pre-folded into W1)
    # b1    : (1, hidden)            f32    (b_enc pre-folded in)
    # w2    : (hidden, lm_hidden)    bf16,  b2  (1, lm_hidden) f32
    # wlm   : (lm_hidden, tn)        bf16,  blm (1, tn)        f32
    # refs  : [embed_ref?] logits_ref emb_vmem
    if return_embed:
        embed_ref, logits_ref, emb_vmem = refs
    else:
        logits_ref, emb_vmem = refs

    j = pl.program_id(1)  # vocab-tile axis

    # The adapter MLP only depends on the row block -> compute once per row
    # block (j == 0), keep the bf16 speech embedding resident in VMEM scratch
    # for all vocab tiles.
    @pl.when(j == 0)
    def _():
        xb = x_ref[...].astype(jnp.bfloat16)                         # VPU cast
        h = jnp.dot(xb, wc_ref[...], preferred_element_type=jnp.float32)
        h = jnp.maximum(h + b1_ref[...], 0.0)                        # ReLU in f32
        emb = jnp.dot(h.astype(jnp.bfloat16), w2_ref[...],
                      preferred_element_type=jnp.float32) + b2_ref[...]
        emb16 = emb.astype(jnp.bfloat16)
        emb_vmem[...] = emb16
        if return_embed:
            embed_ref[...] = emb16                                   # (tm, lm_hidden)

    logits = jnp.dot(emb_vmem[...], wlm_ref[...],
                     preferred_element_type=jnp.float32) + blm_ref[...]
    logits_ref[...] = logits.astype(logits_ref.dtype)                # (tm, tn)


def fused_speech_pipeline(x, w_comb, b1, w2, b2, w_lm, b_lm, *,
                          return_embed=False, logits_dtype=jnp.float32,
                          max_row_tile=256, max_vocab_tile=2048):
    """x: (rows, K*frame_dim) f32. Returns speech_logits (rows, vocab) and,
    if return_embed, also the speech embeddings (rows, lm_hidden) bf16."""
    rows, kf = x.shape
    hidden = w_comb.shape[1]
    lm_hidden = w2.shape[1]
    vocab = w_lm.shape[1]

    # Row tile: multiple of 16 (bf16 sublane pack); single grid step when the
    # whole row range fits under the cap.
    tm = min(max_row_tile, _round_up(max(rows, 1), 16))
    rows_p = _round_up(rows, tm)
    if rows_p != rows:
        x = jnp.pad(x, ((0, rows_p - rows), (0, 0)))

    # Vocab tile: lane-dense (multiple of 128); one block at toy vocab sizes.
    tn = min(max_vocab_tile, _round_up(vocab, 128))
    vocab_p = _round_up(vocab, tn)
    if vocab_p != vocab:
        w_lm = jnp.pad(w_lm, ((0, 0), (0, vocab_p - vocab)))
        b_lm = jnp.pad(b_lm, ((0, 0), (0, vocab_p - vocab)))

    grid = (rows_p // tm, vocab_p // tn)

    # VMEM budget from the actual block footprint (x3 for double buffering +
    # margin), clamped so it also fits v7x's 64 MiB physical VMEM.
    blk_bytes = (tm * kf * 4 + kf * hidden * 2 + hidden * 4 +
                 hidden * lm_hidden * 2 + lm_hidden * 4 +
                 lm_hidden * tn * 2 + tn * 4 +
                 tm * tn * jnp.dtype(logits_dtype).itemsize +
                 (tm * lm_hidden * 2 if return_embed else 0))
    vmem_limit = int(min(56 * 1024 * 1024,
                         max(16 * 1024 * 1024,
                             3 * blk_bytes + tm * lm_hidden * 2)))

    in_specs = [
        pl.BlockSpec((tm, kf), lambda i, j: (i, 0)),
        pl.BlockSpec((kf, hidden), lambda i, j: (0, 0)),
        pl.BlockSpec((1, hidden), lambda i, j: (0, 0)),
        pl.BlockSpec((hidden, lm_hidden), lambda i, j: (0, 0)),
        pl.BlockSpec((1, lm_hidden), lambda i, j: (0, 0)),
        pl.BlockSpec((lm_hidden, tn), lambda i, j: (0, j)),
        pl.BlockSpec((1, tn), lambda i, j: (0, j)),
    ]

    out_shapes, out_specs = [], []
    if return_embed:
        out_shapes.append(jax.ShapeDtypeStruct((rows_p, lm_hidden), jnp.bfloat16))
        out_specs.append(pl.BlockSpec((tm, lm_hidden), lambda i, j: (i, 0)))
    out_shapes.append(jax.ShapeDtypeStruct((rows_p, vocab_p), logits_dtype))
    out_specs.append(pl.BlockSpec((tm, tn), lambda i, j: (i, j)))

    outs = pl.pallas_call(
        functools.partial(_slam_speech_kernel, return_embed=return_embed),
        out_shape=tuple(out_shapes),
        grid=grid,
        in_specs=in_specs,
        out_specs=tuple(out_specs),
        scratch_shapes=[pltpu.VMEM((tm, lm_hidden), jnp.bfloat16)],
        compiler_params=pltpu.CompilerParams(
            dimension_semantics=("parallel", "arbitrary"),
            vmem_limit_bytes=vmem_limit),
    )(x, w_comb, b1, w2, b2, w_lm, b_lm)

    logits = outs[-1][:rows, :vocab]
    if return_embed:
        return outs[0][:rows], logits
    return logits


# ----------------------------------------------------------------------------
# SLAM_ASR (Pallas/JAX)
# ----------------------------------------------------------------------------
class SlamAsrPallas:
    """Synthetic SLAM_ASR: HuBERT stand-in + downsample-K adapter + LM-head stand-in.

    Matches the PyTorch forward semantics:
      speech_output, mask = speech_encoder(audios)
      prompt_embed = cat([embed1, speech_output, embed2], dim=1)
      prompt_mask  = cat([att1,  mask,          att2 ], dim=1)
      outputs = language_model(inputs_embeds=prompt_embed, attention_mask=...)
    Because embed1/embed2 are fixed, their LM-head logits are constant-folded
    at init and forward() concatenates logits instead of embeddings.
    """

    def __init__(self, key, *, frame_dim=128, enc_dim=128, downsample_K=5,
                 hidden_dim=256, lm_hidden=128, vocab=256,
                 prompt1_len=3, prompt2_len=5):
        self.K = downsample_K
        self.frame_dim = frame_dim
        self.enc_dim = enc_dim
        self.hidden_dim = hidden_dim
        self.lm_hidden = lm_hidden
        self.vocab = vocab

        ks = jax.random.split(key, 10)
        s = lambda k, shape, fan_in: (jax.random.normal(k, shape, jnp.float32)
                                      / jnp.sqrt(jnp.float32(fan_in)))
        # TODO(synk): pretrained HuBERT transformer replaced by a single linear
        # feature projection (no clean Pallas equivalent without weights).
        w_enc = s(ks[0], (frame_dim, enc_dim), frame_dim)
        b_enc = 0.1 * jax.random.normal(ks[1], (1, enc_dim), jnp.float32)
        # Adapter (the trainable part of SLAM_ASR): Linear -> ReLU -> Linear
        w1 = s(ks[2], (downsample_K * enc_dim, hidden_dim), downsample_K * enc_dim)
        b1 = 0.1 * jax.random.normal(ks[3], (1, hidden_dim), jnp.float32)
        self.w2 = s(ks[4], (hidden_dim, lm_hidden), hidden_dim).astype(jnp.bfloat16)
        self.b2 = 0.1 * jax.random.normal(ks[5], (1, lm_hidden), jnp.float32)
        # TODO(synk): LLaMA decoder stack replaced by a single lm_head
        # projection (pretrained LM cannot be loaded here).
        self.w_lm = s(ks[6], (lm_hidden, vocab), lm_hidden).astype(jnp.bfloat16)
        self.b_lm = 0.1 * jax.random.normal(ks[7], (1, vocab), jnp.float32)

        # Host-side constant folds (valid only while the encoder stand-in is
        # linear): fold the per-frame encoder projection into W1 and b_enc
        # into b1, so the kernel is a plain 3-matmul MLP.
        self.w_comb = jnp.concatenate(
            [w_enc @ w1[k * enc_dim:(k + 1) * enc_dim, :]
             for k in range(downsample_K)], axis=0).astype(jnp.bfloat16)
        self.b1 = b1 + jnp.tile(b_enc, (1, downsample_K)) @ w1       # (1, hidden) f32

        # Precomputed prompt embeddings (set_embed_bank equivalent):
        # "<s>user:" and ", transcribe the audio to text</s>\n<s>assistant:"
        self.embed1 = s(ks[8], (1, prompt1_len, lm_hidden), lm_hidden).astype(jnp.bfloat16)
        self.embed2 = s(ks[9], (1, prompt2_len, lm_hidden), lm_hidden).astype(jnp.bfloat16)
        self.att1 = jnp.ones((1, prompt1_len), jnp.int32)
        self.att2 = jnp.ones((1, prompt2_len), jnp.int32)
        # Constant-fold the prompt logits once (prompts are fixed), so the
        # LM-head kernel only ever runs over the speech rows.
        def _prompt_logits(e):
            lg = jnp.dot(e[0], self.w_lm,
                         preferred_element_type=jnp.float32) + self.b_lm
            return lg[None]
        self.logits1 = _prompt_logits(self.embed1)
        self.logits2 = _prompt_logits(self.embed2)

    # --- fused SpeechEncoder + LM head over speech rows ----------------------
    def speech_encoder_and_head(self, audios, return_embed=True):
        # audios: (B, T, frame_dim) raw audio frames (f32)
        B, T, F = audios.shape
        assert F == self.frame_dim
        # downsample_K stacks K consecutive frames; the last T % K frames are
        # truncated (same as the reference K-frame stacking).
        T_ds = T // self.K
        rows = B * T_ds
        x = audios[:, :T_ds * self.K, :].reshape(rows, self.K * F)   # free reshape; cast is in-kernel
        out = fused_speech_pipeline(
            x, self.w_comb, self.b1, self.w2, self.b2, self.w_lm, self.b_lm,
            return_embed=return_embed)
        if return_embed:
            embed, logits = out
            speech_embed = embed.reshape(B, T_ds, self.lm_hidden)
        else:
            logits = out
            speech_embed = None
        speech_logits = logits.reshape(B, T_ds, self.vocab)
        mask = jnp.ones((B, T_ds), jnp.int32)
        return speech_embed, speech_logits, mask

    # --- _prepare_input_embeds (API parity; forward uses the folded path) ----
    def _prepare_input_embeds(self, audios):
        speech_embed, _, mask = self.speech_encoder_and_head(audios, return_embed=True)
        B = speech_embed.shape[0]
        prompt_embed = jnp.concatenate(
            [jnp.tile(self.embed1, (B, 1, 1)), speech_embed,
             jnp.tile(self.embed2, (B, 1, 1))], axis=1)
        prompt_mask = jnp.concatenate(
            [jnp.tile(self.att1, (B, 1)), mask, jnp.tile(self.att2, (B, 1))], axis=1)
        return prompt_embed, prompt_mask, None

    # --- forward --------------------------------------------------------------
    def forward(self, audios):
        # forward() never needs the speech embeddings themselves (prompt-logit
        # concat path), so the kernel variant without the embed output is used
        # and no (rows, lm_hidden) tensor is ever written to HBM.
        _, speech_logits, mask = self.speech_encoder_and_head(audios, return_embed=False)
        B = speech_logits.shape[0]
        prompt_mask = jnp.concatenate(
            [jnp.tile(self.att1, (B, 1)), mask, jnp.tile(self.att2, (B, 1))], axis=1)
        logits = jnp.concatenate(
            [jnp.tile(self.logits1, (B, 1, 1)),
             speech_logits,
             jnp.tile(self.logits2, (B, 1, 1))], axis=1)
        return logits, prompt_mask.astype(jnp.bool_)


# ----------------------------------------------------------------------------
if __name__ == "__main__":
    key = jax.random.PRNGKey(0)
    k_params, k_audio = jax.random.split(key)

    model = SlamAsrPallas(k_params)

    # 2 audios, 172 frames of 128 samples: exercises the T % K truncation
    # (172 -> 170 frames) and the row-padding path (68 rows -> one 80-row tile).
    B, T, F = 2, 172, 128
    audios = jax.random.normal(k_audio, (B, T, F), jnp.float32)

    logits, prompt_mask = jax.block_until_ready(model.forward(audios))

    T_ds = T // model.K                       # 34
    S = 3 + T_ds + 5                          # prompt1 + speech + prompt2
    assert logits.shape == (B, S, model.vocab), logits.shape
    assert prompt_mask.shape == (B, S), prompt_mask.shape
    assert bool(jnp.all(prompt_mask)), "prompt mask should be all-true"
    assert bool(jnp.all(jnp.isfinite(logits)))

    # Pure-JAX reference with the identical folded-weight bf16-matmul /
    # f32-accumulate recipe.
    def ref_speech(a):
        x = (a[:, :T_ds * model.K, :]
             .reshape(B * T_ds, model.K * F).astype(jnp.bfloat16))
        h = jnp.dot(x, model.w_comb, preferred_element_type=jnp.float32) + model.b1
        h = jnp.maximum(h, 0.0)
        emb = (jnp.dot(h.astype(jnp.bfloat16), model.w2,
                       preferred_element_type=jnp.float32) + model.b2
               ).astype(jnp.bfloat16)
        lg = jnp.dot(emb, model.w_lm,
                     preferred_element_type=jnp.float32) + model.b_lm
        return emb.reshape(B, T_ds, -1), lg.reshape(B, T_ds, -1)

    ref_emb, ref_logits = ref_speech(audios)
    got_emb, got_logits, _ = model.speech_encoder_and_head(audios, return_embed=True)
    assert jnp.allclose(got_logits, ref_logits, atol=3e-2, rtol=3e-2), "logits mismatch"
    assert jnp.allclose(got_emb.astype(jnp.float32), ref_emb.astype(jnp.float32),
                        atol=3e-2, rtol=3e-2), "speech embed mismatch"
    # speech rows of the full forward must equal the speech-only kernel output
    assert jnp.allclose(logits[:, 3:3 + T_ds, :], got_logits, atol=1e-3)

    print("KERNEL_OK")
</pallas_src>

<mosaic_0001>
module attributes {stable_mosaic.version = 11 : i64} {
  func.func @_slam_speech_kernel(%arg0: i32, %arg1: i32, %arg2: memref<80x640xf32, #tpu.memory_space<vmem>>, %arg3: memref<640x256xbf16, #tpu.memory_space<vmem>>, %arg4: memref<1x256xf32, #tpu.memory_space<vmem>>, %arg5: memref<256x128xbf16, #tpu.memory_space<vmem>>, %arg6: memref<1x128xf32, #tpu.memory_space<vmem>>, %arg7: memref<128x256xbf16, #tpu.memory_space<vmem>>, %arg8: memref<1x256xf32, #tpu.memory_space<vmem>>, %arg9: memref<80x256xf32, #tpu.memory_space<vmem>>, %arg10: memref<80x128xbf16, #tpu.memory_space<vmem>>) attributes {dimension_semantics = [#tpu.dimension_semantics<parallel>, #tpu.dimension_semantics<arbitrary>], iteration_bounds = array<i64: 1, 1>, scalar_prefetch = 0 : i64, scratch_operands = 1 : i64, tpu.core_type = #tpu.core_type<tc>, window_params = [{transform_indices = @transform_0, window_bounds = array<i64: 80, 640>}, {pipeline_mode = #tpu.pipeline_mode<synchronous>, transform_indices = @transform_1, window_bounds = array<i64: 640, 256>}, {pipeline_mode = #tpu.pipeline_mode<synchronous>, transform_indices = @transform_2, window_bounds = array<i64: 1, 256>}, {pipeline_mode = #tpu.pipeline_mode<synchronous>, transform_indices = @transform_3, window_bounds = array<i64: 256, 128>}, {pipeline_mode = #tpu.pipeline_mode<synchronous>, transform_indices = @transform_4, window_bounds = array<i64: 1, 128>}, {transform_indices = @transform_5, window_bounds = array<i64: 128, 256>}, {transform_indices = @transform_6, window_bounds = array<i64: 1, 256>}, {transform_indices = @transform_7, window_bounds = array<i64: 80, 256>}]} {
    %c0_i32 = arith.constant 0 : i32
    %0 = arith.cmpi eq, %arg1, %c0_i32 : i32
    %1 = arith.extui %0 : i1 to i32
    %c0_i32_0 = arith.constant 0 : i32
    %2 = arith.cmpi ne, %1, %c0_i32_0 : i32
    scf.if %2 {
      %c0_8 = arith.constant 0 : index
      %c0_9 = arith.constant 0 : index
      %10 = vector.load %arg2[%c0_8, %c0_9] : memref<80x640xf32, #tpu.memory_space<vmem>>, vector<80x640xf32>
      %11 = arith.truncf %10 : vector<80x640xf32> to vector<80x640xbf16>
      %c0_10 = arith.constant 0 : index
      %c0_11 = arith.constant 0 : index
      %12 = vector.load %arg3[%c0_10, %c0_11] : memref<640x256xbf16, #tpu.memory_space<vmem>>, vector<640x256xbf16>
      %cst_12 = arith.constant dense<0.000000e+00> : vector<80x256xf32>
      %13 = tpu.matmul %11, %12, %cst_12 {dimension_numbers = #tpu.dot_dimension_numbers<[1], [0], [0], [1], [0, 0, 1, 1], [], []>} : vector<80x640xbf16>, vector<640x256xbf16>, vector<80x256xf32> -> vector<80x256xf32>
      %c0_13 = arith.constant 0 : index
      %c0_14 = arith.constant 0 : index
      %14 = vector.load %arg4[%c0_13, %c0_14] : memref<1x256xf32, #tpu.memory_space<vmem>>, vector<1x256xf32>
      %15 = vector.broadcast %14 : vector<1x256xf32> to vector<80x256xf32>
      %16 = arith.addf %13, %15 : vector<80x256xf32>
      %cst_15 = arith.constant 0.000000e+00 : f32
      %17 = vector.broadcast %cst_15 : f32 to vector<80x256xf32>
      %18 = arith.maximumf %16, %17 : vector<80x256xf32>
      %19 = arith.truncf %18 : vector<80x256xf32> to vector<80x256xbf16>
      %c0_16 = arith.constant 0 : index
      %c0_17 = arith.constant 0 : index
      %20 = vector.load %arg5[%c0_16, %c0_17] : memref<256x128xbf16, #tpu.memory_space<vmem>>, vector<256x128xbf16>
      %cst_18 = arith.constant dense<0.000000e+00> : vector<80x128xf32>
      %21 = tpu.matmul %19, %20, %cst_18 {dimension_numbers = #tpu.dot_dimension_numbers<[1], [0], [0], [1], [0, 0, 1, 1], [], []>} : vector<80x256xbf16>, vector<256x128xbf16>, vector<80x128xf32> -> vector<80x128xf32>
      %c0_19 = arith.constant 0 : index
      %c0_20 = arith.constant 0 : index
      %22 = vector.load %arg6[%c0_19, %c0_20] : memref<1x128xf32, #tpu.memory_space<vmem>>, vector<1x128xf32>
      %23 = vector.broadcast %22 : vector<1x128xf32> to vector<80x128xf32>
      %24 = arith.addf %21, %23 : vector<80x128xf32>
      %25 = arith.truncf %24 : vector<80x128xf32> to vector<80x128xbf16>
      %c0_21 = arith.constant 0 : index
      %c0_22 = arith.constant 0 : index
      %26 = vector.load %arg10[%c0_21, %c0_22] : memref<80x128xbf16, #tpu.memory_space<vmem>>, vector<80x128xbf16>
      tpu.vector_store %arg10[%c0_21, %c0_22], %25 {strides = array<i32>} : memref<80x128xbf16, #tpu.memory_space<vmem>>, vector<80x128xbf16>,
    } else {
    }
    %c0 = arith.constant 0 : index
    %c0_1 = arith.constant 0 : index
    %3 = vector.load %arg10[%c0, %c0_1] : memref<80x128xbf16, #tpu.memory_space<vmem>>, vector<80x128xbf16>
    %c0_2 = arith.constant 0 : index
    %c0_3 = arith.constant 0 : index
    %4 = vector.load %arg7[%c0_2, %c0_3] : memref<128x256xbf16, #tpu.memory_space<vmem>>, vector<128x256xbf16>
    %cst = arith.constant dense<0.000000e+00> : vector<80x256xf32>
    %5 = tpu.matmul %3, %4, %cst {dimension_numbers = #tpu.dot_dimension_numbers<[1], [0], [0], [1], [0, 0, 1, 1], [], []>} : vector<80x128xbf16>, vector<128x256xbf16>, vector<80x256xf32> -> vector<80x256xf32>
    %c0_4 = arith.constant 0 : index
    %c0_5 = arith.constant 0 : index
    %6 = vector.load %arg8[%c0_4, %c0_5] : memref<1x256xf32, #tpu.memory_space<vmem>>, vector<1x256xf32>
    %7 = vector.broadcast %6 : vector<1x256xf32> to vector<80x256xf32>
    %8 = arith.addf %5, %7 : vector<80x256xf32>
    %c0_6 = arith.constant 0 : index
    %c0_7 = arith.constant 0 : index
    %9 = vector.load %arg9[%c0_6, %c0_7] : memref<80x256xf32, #tpu.memory_space<vmem>>, vector<80x256xf32>
    tpu.vector_store %arg9[%c0_6, %c0_7], %8 {strides = array<i32>} : memref<80x256xf32, #tpu.memory_space<vmem>>, vector<80x256xf32>,
    return
  }
  func.func @transform_0(%arg0: i32, %arg1: i32) -> (i32, i32) {
    %c0_i32 = arith.constant 0 : i32
    %c0_i32_0 = arith.constant 0 : i32
    return %arg0, %c0_i32 : i32, i32
  }
  func.func @transform_1(%arg0: i32, %arg1: i32) -> (i32, i32) {
    %c0_i32 = arith.constant 0 : i32
    %c0_i32_0 = arith.constant 0 : i32
    %c0_i32_1 = arith.constant 0 : i32
    return %c0_i32, %c0_i32_0 : i32, i32
  }
  func.func @transform_2(%arg0: i32, %arg1: i32) -> (i32, i32) {
    %c0_i32 = arith.constant 0 : i32
    %c0_i32_0 = arith.constant 0 : i32
    %c0_i32_1 = arith.constant 0 : i32
    return %c0_i32, %c0_i32_0 : i32, i32
  }
  func.func @transform_3(%arg0: i32, %arg1: i32) -> (i32, i32) {
    %c0_i32 = arith.constant 0 : i32
    %c0_i32_0 = arith.constant 0 : i32
    %c0_i32_1 = arith.constant 0 : i32
    return %c0_i32, %c0_i32_0 : i32, i32
  }
  func.func @transform_4(%arg0: i32, %arg1: i32) -> (i32, i32) {
    %c0_i32 = arith.constant 0 : i32
    %c0_i32_0 = arith.constant 0 : i32
    %c0_i32_1 = arith.constant 0 : i32
    return %c0_i32, %c0_i32_0 : i32, i32
  }
  func.func @transform_5(%arg0: i32, %arg1: i32) -> (i32, i32) {
    %c0_i32 = arith.constant 0 : i32
    %c0_i32_0 = arith.constant 0 : i32
    return %c0_i32, %arg1 : i32, i32
  }
  func.func @transform_6(%arg0: i32, %arg1: i32) -> (i32, i32) {
    %c0_i32 = arith.constant 0 : i32
    %c0_i32_0 = arith.constant 0 : i32
    return %c0_i32, %arg1 : i32, i32
  }
  func.func @transform_7(%arg0: i32, %arg1: i32) -> (i32, i32) {
    %c0_i32 = arith.constant 0 : i32
    return %arg0, %arg1 : i32, i32
  }
}

</mosaic_0001>

<bundles_post_ra>
// kernel: tpu_custom_call.1
= control target key start
LH: loop header
LB: loop body
LE: loop exit
PB: predicated region body
PF: predicated region fallthrough
CT: control target
= control target key end

     0   :  { %12 = vsyncpa [#allocation4], 0  ;;  %s2598_s0 = inlined_call_operand.hbm [shape: f32[80,640], index: 0, kind: input, shape index: {}]   ;;  %s2599_s1 = inlined_call_operand.hbm [shape: bf16[640,256], index: 1, kind: input, shape index: {}]   ;;  %s2600_s2 = inlined_call_operand.hbm [shape: f32[1,256], index: 2, kind: input, shape index: {}]   ;;  %s2601_s3 = inlined_call_operand.hbm [shape: bf16[256,128], index: 3, kind: input, shape index: {}]   ;;  %s2602_s4 = inlined_call_operand.vmem [shape: f32[1,128], index: 4, kind: input, shape index: {}]   ;;  %s2603_s5 = inlined_call_operand.hbm [shape: bf16[128,256], index: 5, kind: input, shape index: {}]   ;;  %s2604_s6 = inlined_call_operand.vmem [shape: f32[1,256], index: 6, kind: input, shape index: {}]   ;;  %s2605_s7 = inlined_call_operand.hbm [shape: f32[80,256], index: 7, kind: output, shape index: {}]  }
   0x1   :  { %13 = vsyncpa [#allocation7], 0 }
   0x2   :  { %14 = vsyncpa [#allocation10], 0  ;;  %s33_s26 = sshll.u32 %s2599_s1, 4  ;;  %s34_s26 = int_to_ptr.hbm [resolvable:$true] %s33_s26 }
   0x3   :  { %15 = vsyncpa [#allocation5], 0  ;;  %s2306_s27 = smov [#allocation6]   ;;  %s57_s8 = sshll.u32 %s2601_s3, 4  ;;  %s58_s8 = int_to_ptr.hbm [resolvable:$true] %s57_s8 }
   0x4   :  { %s35_s28 = sshll.u32 %s2306_s27, 4  ;;  %s2307_s9 = smov 128   ;;  %s36_s28 = int_to_ptr.vmem [resolvable:$true] %s35_s28 }
   0x5   :  { %s2308_s10 = smov 8   ;;  %s2309_s11 = smov [#allocation9]  }
   0x6   :  { %41 = dma.hbm_to_vmem [thread:$0]  %s34_s26, 10240, %s36_s28, [#allocation7], %s2307_s9, %s2307_s9, %s2308_s10  }
   0x7   :  { %s59_s12 = sshll.u32 %s2309_s11, 4  ;;  %s2310_s1 = smov 64   ;;  %s60_s12 = int_to_ptr.vmem [resolvable:$true] %s59_s12 }
   0x8   :  { %s2311_s13 = smov 4   ;;  %s20_s16 = sshll.u32 %s2598_s0, 4  ;;  %s21_s16 = int_to_ptr.hbm [resolvable:$true] %s20_s16 }
   0x9   :  { %65 = dma.hbm_to_vmem [thread:$0]  %s58_s8, 2048, %s60_s12, [#allocation10], %s2310_s1, %s2310_s1, %s2311_s13  }
   0xa   :  { %s2312_s17 = smov [#allocation3]   ;;  %s47_s20 = sshll.u32 %s2600_s2, 4  ;;  %s48_s20 = int_to_ptr.hbm [resolvable:$true] %s47_s20 }
   0xb   :  { %s22_s3 = sshll.u32 %s2312_s17, 4  ;;  %s2313_s21 = smov 640   ;;  %s23_s3 = int_to_ptr.vmem [resolvable:$true] %s22_s3 }
   0xc   :  { %s2314_s22 = smov 40   ;;  %s2315_s23 = smov [#allocation8]  }
   0xd   :  { %28 = dma.hbm_to_vmem [thread:$0]  %s21_s16, 6400, %s23_s3, [#allocation4], %s2313_s21, %s2313_s21, %s2314_s22  }
   0xe   :  { %s49_s24 = sshll.u32 %s2315_s23, 4  ;;  %s72_s27 = sshll.u32 %s2603_s5, 4  ;;  %s50_s24 = int_to_ptr.vmem [resolvable:$true] %s49_s24  ;;  %s73_s27 = int_to_ptr.hbm [resolvable:$true] %s72_s27 }
   0xf   :  { %52 = dma.hbm_to_vmem [thread:$0]  %s48_s20, 32, %s50_s24, [#allocation7]  }
  0x10   :  { %s2316_s0 = smov [#allocation11]  }
  0x11   :  { %s74_s28 = sshll.u32 %s2316_s0, 4  ;;  %s75_s28 = int_to_ptr.vmem [resolvable:$true] %s74_s28 }
  0x12   :  { %80 = dma.hbm_to_vmem [thread:$0]  %s73_s27, 2048, %s75_s28, [#allocation10], %s2307_s9, %s2307_s9, %s2308_s10  }
  0x13   :  { %2298 = dma.done.wait [#allocation4], 6400  }
  0x14   :  { %2299 = vsyncadd [#allocation4], 4294960896 }
  0x15   :  { %2300 = dma.done.wait [#allocation7], 10272  }
  0x16   :  { %2301 = vsyncadd [#allocation7], 4294957024 }
  0x17   :  { %2302 = dma.done.wait [#allocation10], 4096  }
  0x18   :  { %2303 = vsyncadd [#allocation10], 4294963200  ;;  %v1567_v0 = vld [vmem:[#allocation6 + $0x70] sm:$0xf]  ;;  %v1992_v1 = vld [vmem:[#allocation6 + $0x74] sm:$0xf0] }
  0x19   :  { %v1631_v2 = vld [vmem:[#allocation6 + $0xf0] sm:$0xf]  ;;  %v1568_v3 = vor.u32 %v1992_v1, %v1567_v0  ;;  %v2008_v4 = vld [vmem:[#allocation6 + $0xf4] sm:$0xf0]  ;;  %v1559_v5 = vld [vmem:[#allocation6 + $0x60] sm:$0xf] }
  0x1a   :  { %v1990_v6 = vld [vmem:[#allocation6 + $0x64] sm:$0xf0]  ;;  %v1632_v7 = vor.u32 %v2008_v4, %v1631_v2  ;;  %v1623_v8 = vld [vmem:[#allocation6 + $0xe0] sm:$0xf]  ;;  %v1551_v12 = vld [vmem:[#allocation6 + $0x50] sm:$0xf] }
  0x1b   :  { %v2006_v9 = vld [vmem:[#allocation6 + $0xe4] sm:$0xf0]  ;;  %2123 = vmatpush.bf16.msra.mxu2 %v1568_v3  ;;  %v1560_v10 = vor.u32 %v1990_v6, %v1559_v5  ;;  %668 = vmatpush.bf16.msra.mxu0 %v1568_v3  ;;  %v1988_v13 = vld [vmem:[#allocation6 + $0x54] sm:$0xf0]  ;;  %v1615_v14 = vld [vmem:[#allocation6 + $0xd0] sm:$0xf] }
  0x1c   :  { %2131 = vmatpush.bf16.msra.mxu3 %v1632_v7  ;;  %v1624_v11 = vor.u32 %v2006_v9, %v1623_v8  ;;  %702 = vmatpush.bf16.msra.mxu1 %v1632_v7  ;;  %v2004_v15 = vld [vmem:[#allocation6 + $0xd4] sm:$0xf0]  ;;  %v1552_v16 = vor.u32 %v1988_v13, %v1551_v12  ;;  %v1543_v18 = vld [vmem:[#allocation6 + $0x40] sm:$0xf]  ;;  %v1986_v19 = vld [vmem:[#allocation6 + $0x44] sm:$0xf0] }
  0x1d   :  { %v1616_v17 = vor.u32 %v2004_v15, %v1615_v14  ;;  %v1607_v20 = vld [vmem:[#allocation6 + $0xc0] sm:$0xf]  ;;  %v2002_v21 = vld [vmem:[#allocation6 + $0xc4] sm:$0xf0]  ;;  %v1544_v22 = vor.u32 %v1986_v19, %v1543_v18  ;;  %v1535_v24 = vld [vmem:[#allocation6 + $0x30] sm:$0xf] }
  0x1e   :  { %v1608_v23 = vor.u32 %v2002_v21, %v1607_v20  ;;  %v1984_v25 = vld [vmem:[#allocation6 + $0x34] sm:$0xf0]  ;;  %v1599_v26 = vld [vmem:[#allocation6 + $0xb0] sm:$0xf]  ;;  %v1527_v30 = vld [vmem:[#allocation6 + $0x20] sm:$0xf] }
  0x1f   :  { %2124 = vmatpush.bf16.msra.mxu2 %v1560_v10  ;;  %669 = vmatpush.bf16.msra.mxu0 %v1560_v10  ;;  %v2000_v27 = vld [vmem:[#allocation6 + $0xb4] sm:$0xf0]  ;;  %v1536_v28 = vor.u32 %v1984_v25, %v1535_v24  ;;  %v1982_v31 = vld [vmem:[#allocation6 + $0x24] sm:$0xf0]  ;;  %v1591_v32 = vld [vmem:[#allocation6 + $0xa0] sm:$0xf] }
  0x20   :  { %2132 = vmatpush.bf16.msra.mxu3 %v1624_v11  ;;  %703 = vmatpush.bf16.msra.mxu1 %v1624_v11  ;;  %v1600_v29 = vor.u32 %v2000_v27, %v1599_v26  ;;  %v1998_v33 = vld [vmem:[#allocation6 + $0xa4] sm:$0xf0]  ;;  %v1528_v34 = vor.u32 %v1982_v31, %v1527_v30  ;;  %v1519_v36 = vld [vmem:[#allocation6 + $0x10] sm:$0xf]  ;;  %v1980_v37 = vld [vmem:[#allocation6 + $0x14] sm:$0xf0] }
  0x21   :  { %v1592_v35 = vor.u32 %v1998_v33, %v1591_v32  ;;  %v1583_v38 = vld [vmem:[#allocation6 + $0x90] sm:$0xf]  ;;  %v1996_v39 = vld [vmem:[#allocation6 + $0x94] sm:$0xf0]  ;;  %v1520_v40 = vor.u32 %v1980_v37, %v1519_v36  ;;  %v1511_v41 = vld [vmem:[#allocation6] sm:$0xf] }
  0x22   :  { %v1584_v42 = vor.u32 %v1996_v39, %v1583_v38  ;;  %v1978_v43 = vld [vmem:[#allocation6 + $0x4] sm:$0xf0]  ;;  %v1575_v44 = vld [vmem:[#allocation6 + $0x80] sm:$0xf]  ;;  %v127_v46 = vld [vmem:[#allocation3 + $0xa0] sm:$0xff]  ;;  %s1494_s10 = sshll.u32 %s2605_s7, 4  ;;  %s1495_s10 = int_to_ptr.hbm [resolvable:$true] %s1494_s10 }
  0x23   :  { %2125 = vmatpush.bf16.msra.mxu2 %v1552_v16  ;;  %670 = vmatpush.bf16.msra.mxu0 %v1552_v16  ;;  %v1994_v45 = vld [vmem:[#allocation6 + $0x84] sm:$0xf0]  ;;  %v132_v47 = vld [vmem:[#allocation3 + $0xc8] sm:$0xff]  ;;  %v1695_v48 = vld [vmem:[#allocation6 + $0x170] sm:$0xf]  ;;  %v1512_v54 = vor.u32 %v1978_v43, %v1511_v41  ;;  %s2318_s11 = smov 256  }
  0x24   :  { %2133 = vmatpush.bf16.msra.mxu3 %v1616_v17  ;;  %704 = vmatpush.bf16.msra.mxu1 %v1616_v17  ;;  %v2024_v49 = vld [vmem:[#allocation6 + $0x174] sm:$0xf0]  ;;  %v133_v51 = vld [vmem:[#allocation3 + $0xd0] sm:$0xff]  ;;  %v1759_v52 = vld [vmem:[#allocation6 + $0x1f0] sm:$0xf]  ;;  %v1576_v58 = vor.u32 %v1994_v45, %v1575_v44  ;;  %v2381_v3 = vpack.c.bf16 %v132_v47, %v127_v46  ;;  %s2319_s12 = smov 16  }
  0x25   :  { %v128_v50 = vld [vmem:[#allocation3 + $0xa8] sm:$0xff]  ;;  %v1687_v55 = vld [vmem:[#allocation6 + $0x160] sm:$0xf]  ;;  %v107_v56 = vld [vmem:[#allocation3] sm:$0xff]  ;;  %v1696_v59 = vor.u32 %v2024_v49, %v1695_v48 }
  0x26   :  { %v2040_v53 = vld [vmem:[#allocation6 + $0x1f4] sm:$0xf0]  ;;  %v2022_v60 = vld [vmem:[#allocation6 + $0x164] sm:$0xf0]  ;;  %v1823_v61 = vld [vmem:[#allocation6 + $0x270] sm:$0xf]  ;;  %v2385_v8 = vpack.c.bf16 %v133_v51, %v128_v50 }
  0x27   :  { %2126 = vmatpush.bf16.msra.mxu2 %v1544_v22  ;;  %671 = vmatpush.bf16.msra.mxu0 %v1544_v22  ;;  %v112_v57 = vld [vmem:[#allocation3 + $0x28] sm:$0xff]  ;;  %v1760_v63 = vor.u32 %v2040_v53, %v1759_v52  ;;  %v1751_v0 = vld [vmem:[#allocation6 + $0x1e0] sm:$0xf]  ;;  %v2038_v4 = vld [vmem:[#allocation6 + $0x1e4] sm:$0xf0]  ;;  %v1688_v10 = vor.u32 %v2022_v60, %v1687_v55 }
  0x28   :  { %2134 = vmatpush.bf16.msra.mxu3 %v1608_v23  ;;  %705 = vmatpush.bf16.msra.mxu1 %v1608_v23  ;;  %v2056_v62 = vld [vmem:[#allocation6 + $0x274] sm:$0xf0]  ;;  %v113_v2 = vld [vmem:[#allocation3 + $0x30] sm:$0xff]  ;;  %v2383_v5 = vpack.c.bf16 %v112_v57, %v107_v56  ;;  %v1991_v6 = vld [vmem:[#allocation6 + $0x74] sm:$0xf]  ;;  %v1752_v14 = vor.u32 %v2038_v4, %v1751_v0 }
  0x29   :  { %v108_v1 = vld [vmem:[#allocation3 + $0x8] sm:$0xff]  ;;  %v1824_v9 = vor.u32 %v2056_v62, %v1823_v61  ;;  %v1815_v12 = vld [vmem:[#allocation6 + $0x260] sm:$0xf]  ;;  %v2054_v13 = vld [vmem:[#allocation6 + $0x264] sm:$0xf0] }
  0x2a   :  { %v1569_v7 = vld [vmem:[#allocation6 + $0x78] sm:$0xf0]  ;;  %v2387_v11 = vpack.c.bf16 %v113_v2, %v108_v1  ;;  %v1679_v15 = vld [vmem:[#allocation6 + $0x150] sm:$0xf]  ;;  %v2020_v16 = vld [vmem:[#allocation6 + $0x154] sm:$0xf0]  ;;  %v1816_v22 = vor.u32 %v2054_v13, %v1815_v12 }
  0x2b   :  { %2127 = vmatpush.bf16.msra.mxu2 %v1536_v28  ;;  %672 = vmatpush.bf16.msra.mxu0 %v1536_v28  ;;  %v1743_v17 = vld [vmem:[#allocation6 + $0x1d0] sm:$0xf]  ;;  %v1572_v18 = vor.u32 %v1991_v6, %v1569_v7  ;;  %v2036_v19 = vld [vmem:[#allocation6 + $0x1d4] sm:$0xf0]  ;;  %v1989_v20 = vld [vmem:[#allocation6 + $0x64] sm:$0xf]  ;;  %v1680_v23 = vor.u32 %v2020_v16, %v1679_v15 }
  0x2c   :  { %2135 = vmatpush.bf16.msra.mxu3 %v1600_v29  ;;  %706 = vmatpush.bf16.msra.mxu1 %v1600_v29  ;;  %v1561_v21 = vld [vmem:[#allocation6 + $0x68] sm:$0xf0]  ;;  %v1807_v24 = vld [vmem:[#allocation6 + $0x250] sm:$0xf]  ;;  %v2052_v25 = vld [vmem:[#allocation6 + $0x254] sm:$0xf0]  ;;  %v1744_v26 = vor.u32 %v2036_v19, %v1743_v17 }
  0x2d   :  { %v1671_v27 = vld [vmem:[#allocation6 + $0x140] sm:$0xf]  ;;  %v2018_v28 = vld [vmem:[#allocation6 + $0x144] sm:$0xf0]  ;;  %v1564_v30 = vor.u32 %v1989_v20, %v1561_v21  ;;  %v1987_v32 = vld [vmem:[#allocation6 + $0x54] sm:$0xf] }
  0x2e   :  { %v1735_v29 = vld [vmem:[#allocation6 + $0x1c0] sm:$0xf]  ;;  %v2034_v31 = vld [vmem:[#allocation6 + $0x1c4] sm:$0xf0]  ;;  %v1553_v33 = vld [vmem:[#allocation6 + $0x58] sm:$0xf0] }
  0x2f   :  { %2128 = vmatpush.bf16.msra.mxu2 %v1528_v34  ;;  %673 = vmatpush.bf16.msra.mxu0 %v1528_v34  ;;  %v1808_v34 = vor.u32 %v2052_v25, %v1807_v24  ;;  %v1799_v36 = vld [vmem:[#allocation6 + $0x240] sm:$0xf]  ;;  %v2050_v37 = vld [vmem:[#allocation6 + $0x244] sm:$0xf0]  ;;  %v1663_v41 = vld [vmem:[#allocation6 + $0x130] sm:$0xf]  ;;  %v1556_v44 = vor.u32 %v1987_v32, %v1553_v33 }
  0x30   :  { %2136 = vmatpush.bf16.msra.mxu3 %v1592_v35  ;;  %707 = vmatpush.bf16.msra.mxu1 %v1592_v35  ;;  %v1672_v35 = vor.u32 %v2018_v28, %v1671_v27  ;;  %v137_v38 = vld [vmem:[#allocation3 + $0xf0] sm:$0xff]  ;;  %v142_v39 = vld [vmem:[#allocation3 + $0x118] sm:$0xff]  ;;  %v1727_v43 = vld [vmem:[#allocation6 + $0x1b0] sm:$0xf]  ;;  %v1800_v51 = vor.u32 %v2050_v37, %v1799_v36 }
  0x31   :  { %v138_v45 = vld [vmem:[#allocation3 + $0xf8] sm:$0xff]  ;;  %v143_v46 = vld [vmem:[#allocation3 + $0x120] sm:$0xff]  ;;  %v2032_v47 = vld [vmem:[#allocation6 + $0x1b4] sm:$0xf0] }
  0x32   :  { %v1985_v48 = vld [vmem:[#allocation6 + $0x44] sm:$0xf]  ;;  %v1545_v49 = vld [vmem:[#allocation6 + $0x48] sm:$0xf0]  ;;  %v1655_v50 = vld [vmem:[#allocation6 + $0x120] sm:$0xf]  ;;  %v2397_v6 = vpack.c.bf16 %v143_v46, %v138_v45 }
  0x33   :  { %2129 = vmatpush.bf16.msra.mxu2 %v1520_v40  ;;  %674 = vmatpush.bf16.msra.mxu0 %v1520_v40  ;;  %v1736_v40 = vor.u32 %v2034_v31, %v1735_v29  ;;  %v117_v52 = vld [vmem:[#allocation3 + $0x50] sm:$0xff]  ;;  %v122_v53 = vld [vmem:[#allocation3 + $0x78] sm:$0xff]  ;;  %v1791_v56 = vld [vmem:[#allocation6 + $0x230] sm:$0xf]  ;;  %v1548_v60 = vor.u32 %v1985_v48, %v1545_v49 }
  0x34   :  { %2137 = vmatpush.bf16.msra.mxu3 %v1584_v42  ;;  %708 = vmatpush.bf16.msra.mxu1 %v1584_v42  ;;  %v2016_v42 = vld [vmem:[#allocation6 + $0x134] sm:$0xf0]  ;;  %v2014_v55 = vld [vmem:[#allocation6 + $0x124] sm:$0xf0]  ;;  %v123_v62 = vld [vmem:[#allocation3 + $0x80] sm:$0xff]  ;;  %v2395_v1 = vpack.c.bf16 %v122_v53, %v117_v52 }
  0x35   :  { %v2048_v57 = vld [vmem:[#allocation6 + $0x234] sm:$0xf0]  ;;  %v118_v61 = vld [vmem:[#allocation3 + $0x58] sm:$0xff]  ;;  %v1983_v2 = vld [vmem:[#allocation6 + $0x34] sm:$0xf] }
  0x36   :  { %v2030_v0 = vld [vmem:[#allocation6 + $0x1a4] sm:$0xf0]  ;;  %v1537_v4 = vld [vmem:[#allocation6 + $0x38] sm:$0xf0]  ;;  %v1792_v7 = vor.u32 %v2048_v57, %v1791_v56  ;;  %v1783_v12 = vld [vmem:[#allocation6 + $0x220] sm:$0xf] }
  0x37   :  { %2130 = vmatpush.bf16.msra.mxu2 %v1512_v54  ;;  %675 = vmatpush.bf16.msra.mxu0 %v1512_v54  ;;  %v1664_v54 = vor.u32 %v2016_v42, %v1663_v41  ;;  %v2046_v13 = vld [vmem:[#allocation6 + $0x224] sm:$0xf0]  ;;  %v1647_v15 = vld [vmem:[#allocation6 + $0x110] sm:$0xf]  ;;  %v2012_v16 = vld [vmem:[#allocation6 + $0x114] sm:$0xf0]  ;;  %v1540_v17 = vor.u32 %v1983_v2, %v1537_v4 }
  0x38   :  { %2138 = vmatpush.bf16.msra.mxu3 %v1576_v58  ;;  %709 = vmatpush.bf16.msra.mxu1 %v1576_v58  ;;  %v1728_v58 = vor.u32 %v2032_v47, %v1727_v43  ;;  %v2028_v19 = vld [vmem:[#allocation6 + $0x194] sm:$0xf0]  ;;  %v1981_v20 = vld [vmem:[#allocation6 + $0x24] sm:$0xf]  ;;  %v1529_v21 = vld [vmem:[#allocation6 + $0x28] sm:$0xf0] }
  0x39   :  { %v1639_v24 = vld [vmem:[#allocation6 + $0x100] sm:$0xf]  ;;  %v1775_v25 = vld [vmem:[#allocation6 + $0x210] sm:$0xf]  ;;  %v1532_v28 = vor.u32 %v1981_v20, %v1529_v21  ;;  %v2010_v29 = vld [vmem:[#allocation6 + $0x104] sm:$0xf0] }
  0x3a   :  { %686 = vmatmul.bf16.vlgmr.msra.gmra.mxu2 %v2381_v3  ;;  %676 = vmatmul.bf16.vlgmr.msra.gmra.mxu0 %v2383_v5  ;;  %v2026_v31 = vld [vmem:[#allocation6 + $0x184] sm:$0xf0]  ;;  %v1979_v32 = vld [vmem:[#allocation6 + $0x14] sm:$0xf]  ;;  %v1521_v33 = vld [vmem:[#allocation6 + $0x18] sm:$0xf0] }
  0x3b   :  { %736 = vmatpush.bf16.msrb.mxu2 %v1696_v59  ;;  %720 = vmatmul.bf16.vlgmr.msra.gmra.mxu3 %v2385_v8  ;;  %v1719_v59 = vld [vmem:[#allocation6 + $0x1a0] sm:$0xf]  ;;  %v1633_v36 = vld [vmem:[#allocation6 + $0xf8] sm:$0xf0]  ;;  %v2023_v37 = vld [vmem:[#allocation6 + $0x174] sm:$0xf] }
  0x3c   :  { %770 = vmatpush.bf16.msrb.mxu3 %v1760_v63  ;;  %804 = vmatpush.bf16.msrb.mxu0 %v1824_v9  ;;  %v2393_v63 = vpack.c.bf16 %v142_v39, %v137_v38  ;;  %v1656_v9 = vor.u32 %v2014_v55, %v1655_v50  ;;  %v1697_v38 = vld [vmem:[#allocation6 + $0x178] sm:$0xf0]  ;;  %v1640_v39 = vor.u32 %v2010_v29, %v1639_v24  ;;  %v2042_v41 = vld [vmem:[#allocation6 + $0x204] sm:$0xf0]  ;;  %v147_v42 = vld [vmem:[#allocation3 + $0x140] sm:$0xff] }
  0x3d   :  { %710 = vmatmul.bf16.vlgmr.msra.gmra.mxu1 %v2387_v11  ;;  %v2039_v45 = vld [vmem:[#allocation6 + $0x1f4] sm:$0xf]  ;;  %v1761_v46 = vld [vmem:[#allocation6 + $0x1f8] sm:$0xf0]  ;;  %v1977_v49 = vld [vmem:[#allocation6 + $0x4] sm:$0xf] }
  0x3e   :  { %838 = vmatpush.bf16.msrb.mxu1 %v1572_v18  ;;  %v1711_v18 = vld [vmem:[#allocation6 + $0x190] sm:$0xf]  ;;  %v152_v47 = vld [vmem:[#allocation3 + $0x168] sm:$0xff]  ;;  %v1513_v50 = vld [vmem:[#allocation6 + $0x8] sm:$0xf0] }
  0x3f   :  { %737 = vmatpush.bf16.msrb.mxu2 %v1688_v10  ;;  %v2399_v10 = vpack.c.bf16 %v123_v62, %v118_v61  ;;  %v1712_v27 = vor.u32 %v2028_v19, %v1711_v18  ;;  %v148_v52 = vld [vmem:[#allocation3 + $0x148] sm:$0xff]  ;;  %v153_v56 = vld [vmem:[#allocation3 + $0x170] sm:$0xff]  ;;  %v1689_v62 = vld [vmem:[#allocation6 + $0x168] sm:$0xf0] }
  0x40   :  { %771 = vmatpush.bf16.msrb.mxu3 %v1752_v14  ;;  %805 = vmatpush.bf16.msrb.mxu0 %v1816_v22  ;;  %v1720_v14 = vor.u32 %v2030_v0, %v1719_v59  ;;  %v1784_v22 = vor.u32 %v2046_v13, %v1783_v12  ;;  %v116_v55 = vld [vmem:[#allocation3 + $0x48] sm:$0xff]  ;;  %v2005_v57 = vld [vmem:[#allocation6 + $0xe4] sm:$0xf]  ;;  %v1764_v59 = vor.u32 %v2039_v45, %v1761_v46  ;;  %v2055_v4 = vld [vmem:[#allocation6 + $0x274] sm:$0xf] }
  0x41   :  { %v2021_v61 = vld [vmem:[#allocation6 + $0x164] sm:$0xf]  ;;  %v2405_v0 = vpack.c.bf16 %v152_v47, %v147_v42  ;;  %v1753_v19 = vld [vmem:[#allocation6 + $0x1e8] sm:$0xf0]  ;;  %v2019_v20 = vld [vmem:[#allocation6 + $0x154] sm:$0xf] }
  0x42   :  { %839 = vmatpush.bf16.msrb.mxu1 %v1564_v30  ;;  %v1703_v30 = vld [vmem:[#allocation6 + $0x180] sm:$0xf]  ;;  %v1692_v13 = vor.u32 %v2021_v61, %v1689_v62  ;;  %v1681_v21 = vld [vmem:[#allocation6 + $0x158] sm:$0xf0]  ;;  %v2053_v24 = vld [vmem:[#allocation6 + $0x264] sm:$0xf] }
  0x43   :  { %738 = vmatpush.bf16.msrb.mxu2 %v1680_v23  ;;  %v1648_v23 = vor.u32 %v2012_v16, %v1647_v15  ;;  %v1704_v43 = vor.u32 %v2026_v31, %v1703_v30  ;;  %v2003_v15 = vld [vmem:[#allocation6 + $0xd4] sm:$0xf]  ;;  %v1617_v16 = vld [vmem:[#allocation6 + $0xd8] sm:$0xf0]  ;;  %v1673_v42 = vld [vmem:[#allocation6 + $0x148] sm:$0xf0] }
  0x44   :  { %772 = vmatpush.bf16.msrb.mxu3 %v1744_v26  ;;  %806 = vmatpush.bf16.msrb.mxu0 %v1808_v34  ;;  %v2044_v26 = vld [vmem:[#allocation6 + $0x214] sm:$0xf0]  ;;  %v2007_v34 = vld [vmem:[#allocation6 + $0xf4] sm:$0xf]  ;;  %v1620_v18 = vor.u32 %v2003_v15, %v1617_v16  ;;  %v1745_v30 = vld [vmem:[#allocation6 + $0x1d8] sm:$0xf0] }
  0x45   :  { %v1636_v48 = vor.u32 %v2007_v34, %v1633_v36  ;;  %v2035_v29 = vld [vmem:[#allocation6 + $0x1d4] sm:$0xf]  ;;  %v121_v34 = vld [vmem:[#allocation3 + $0x70] sm:$0xff]  ;;  %v110_v36 = vld [vmem:[#allocation3 + $0x18] sm:$0xff] }
  0x46   :  { %840 = vmatpush.bf16.msrb.mxu1 %v1556_v44  ;;  %v1524_v44 = vor.u32 %v1979_v32, %v1521_v33  ;;  %v1748_v32 = vor.u32 %v2035_v29, %v1745_v30  ;;  %v114_v33 = vld [vmem:[#allocation3 + $0x38] sm:$0xff]  ;;  %v1809_v45 = vld [vmem:[#allocation6 + $0x258] sm:$0xf0]  ;;  %v1999_v46 = vld [vmem:[#allocation6 + $0xb4] sm:$0xf] }
  0x47   :  { %739 = vmatpush.bf16.msrb.mxu2 %v1672_v35  ;;  %v1776_v35 = vor.u32 %v2044_v26, %v1775_v25  ;;  %v1817_v25 = vld [vmem:[#allocation6 + $0x268] sm:$0xf0]  ;;  %v2001_v26 = vld [vmem:[#allocation6 + $0xc4] sm:$0xf]  ;;  %v1601_v47 = vld [vmem:[#allocation6 + $0xb8] sm:$0xf0] }
  0x48   :  { %773 = vmatpush.bf16.msrb.mxu3 %v1736_v40  ;;  %807 = vmatpush.bf16.msrb.mxu0 %v1800_v51  ;;  %v1767_v40 = vld [vmem:[#allocation6 + $0x200] sm:$0xf]  ;;  %v1700_v51 = vor.u32 %v2023_v37, %v1697_v38  ;;  %v115_v37 = vld [vmem:[#allocation3 + $0x40] sm:$0xff]  ;;  %v136_v61 = vld [vmem:[#allocation3 + $0xe8] sm:$0xff] }
  0x49   :  { %v1768_v53 = vor.u32 %v2042_v41, %v1767_v40  ;;  %v2419_v40 = vpack.c.bf16 %v115_v37, %v110_v36  ;;  %v2017_v41 = vld [vmem:[#allocation6 + $0x144] sm:$0xf]  ;;  %v120_v62 = vld [vmem:[#allocation3 + $0x68] sm:$0xff]  ;;  %v1593_v15 = vld [vmem:[#allocation6 + $0xa8] sm:$0xf0] }
  0x4a   :  { %841 = vmatpush.bf16.msrb.mxu1 %v1548_v60  ;;  %691 = vmatmul.bf16.gmra.mxu2 %v2393_v63  ;;  %v1516_v60 = vor.u32 %v1977_v49, %v1513_v50  ;;  %v1604_v49 = vor.u32 %v1999_v46, %v1601_v47  ;;  %v2033_v50 = vld [vmem:[#allocation6 + $0x1c4] sm:$0xf]  ;;  %v2031_v16 = vld [vmem:[#allocation6 + $0x1b4] sm:$0xf]  ;;  %v1721_v29 = vld [vmem:[#allocation6 + $0x1a8] sm:$0xf0] }
  0x4b   :  { %740 = vmatpush.bf16.msrb.mxu2 %v1664_v54  ;;  %681 = vmatmul.bf16.gmra.mxu0 %v2395_v1  ;;  %v111_v54 = vld [vmem:[#allocation3 + $0x20] sm:$0xff]  ;;  %v129_v36 = vld [vmem:[#allocation3 + $0xb0] sm:$0xff]  ;;  %v134_v37 = vld [vmem:[#allocation3 + $0xd8] sm:$0xff] }
  0x4c   :  { %774 = vmatpush.bf16.msrb.mxu3 %v1728_v58  ;;  %808 = vmatpush.bf16.msrb.mxu0 %v1792_v7  ;;  %v1625_v58 = vld [vmem:[#allocation6 + $0xe8] sm:$0xf0]  ;;  %v2407_v2 = vpack.c.bf16 %v116_v55, %v111_v54  ;;  %v1825_v7 = vld [vmem:[#allocation6 + $0x278] sm:$0xf0]  ;;  %v2049_v55 = vld [vmem:[#allocation6 + $0x244] sm:$0xf] }
  0x4d   :  { %725 = vmatmul.bf16.gmra.mxu3 %v2397_v6  ;;  %715 = vmatmul.bf16.gmra.mxu1 %v2399_v10  ;;  %v1628_v12 = vor.u32 %v2005_v57, %v1625_v58  ;;  %v1665_v54 = vld [vmem:[#allocation6 + $0x138] sm:$0xf0] }
  0x4e   :  { %842 = vmatpush.bf16.msrb.mxu1 %v1540_v17  ;;  %v2037_v17 = vld [vmem:[#allocation6 + $0x1e4] sm:$0xf] }
  0x4f   :  { %741 = vmatpush.bf16.msrb.mxu2 %v1656_v9  ;;  %v2409_v9 = vpack.c.bf16 %v153_v56, %v148_v52  ;;  %v2015_v52 = vld [vmem:[#allocation6 + $0x134] sm:$0xf]  ;;  %v1801_v56 = vld [vmem:[#allocation6 + $0x248] sm:$0xf0] }
  0x50   :  { %775 = vmatpush.bf16.msrb.mxu3 %v1720_v14  ;;  %809 = vmatpush.bf16.msrb.mxu0 %v1784_v22  ;;  %v1828_v14 = vor.u32 %v2055_v4, %v1825_v7  ;;  %v1756_v22 = vor.u32 %v2037_v17, %v1753_v19  ;;  %v1668_v57 = vor.u32 %v2015_v52, %v1665_v54  ;;  %v125_v4 = vld [vmem:[#allocation3 + $0x90] sm:$0xff]  ;;  %v1713_v52 = vld [vmem:[#allocation6 + $0x198] sm:$0xf0]  ;;  %v1641_v54 = vld [vmem:[#allocation6 + $0x108] sm:$0xf0] }
  0x51   :  { %v1804_v58 = vor.u32 %v2049_v55, %v1801_v56  ;;  %v2013_v19 = vld [vmem:[#allocation6 + $0x124] sm:$0xf] }
  0x52   :  { %843 = vmatpush.bf16.msrb.mxu1 %v1532_v28  ;;  %v1609_v28 = vld [vmem:[#allocation6 + $0xc8] sm:$0xf0] }
  0x53   :  { %742 = vmatpush.bf16.msrb.mxu2 %v1648_v23  ;;  %v1684_v23 = vor.u32 %v2019_v20, %v1681_v21  ;;  %v1612_v31 = vor.u32 %v2001_v26, %v1609_v28  ;;  %v1657_v20 = vld [vmem:[#allocation6 + $0x128] sm:$0xf0]  ;;  %v2029_v28 = vld [vmem:[#allocation6 + $0x1a4] sm:$0xf] }
  0x54   :  { %776 = vmatpush.bf16.msrb.mxu3 %v1712_v27  ;;  %810 = vmatpush.bf16.msrb.mxu0 %v1776_v35  ;;  %v1820_v27 = vor.u32 %v2053_v24, %v1817_v25  ;;  %v126_v35 = vld [vmem:[#allocation3 + $0x98] sm:$0xff]  ;;  %v1793_v24 = vld [vmem:[#allocation6 + $0x238] sm:$0xf0]  ;;  %v1995_v25 = vld [vmem:[#allocation6 + $0x94] sm:$0xf] }
  0x56   :  { %844 = vmatpush.bf16.msrb.mxu1 %v1524_v44  ;;  %v1676_v44 = vor.u32 %v2017_v41, %v1673_v42  ;;  %v141_v41 = vld [vmem:[#allocation3 + $0x110] sm:$0xff]  ;;  %v146_v42 = vld [vmem:[#allocation3 + $0x138] sm:$0xff] }
  0x57   :  { %743 = vmatpush.bf16.msrb.mxu2 %v1640_v39  ;;  %v2417_v39 = vpack.c.bf16 %v126_v35, %v121_v34  ;;  %v1785_v34 = vld [vmem:[#allocation6 + $0x228] sm:$0xf0]  ;;  %v2437_v46 = vpack.c.bf16 %v146_v42, %v141_v41 }
  0x58   :  { %777 = vmatpush.bf16.msrb.mxu3 %v1704_v43  ;;  %811 = vmatpush.bf16.msrb.mxu0 %v1768_v53  ;;  %v2051_v43 = vld [vmem:[#allocation6 + $0x254] sm:$0xf] }
  0x5a   :  { %845 = vmatpush.bf16.msrb.mxu1 %v1516_v60  ;;  %696 = vmatmul.bf16.gmra.mxu2 %v2405_v0  ;;  %v131_v60 = vld [vmem:[#allocation3 + $0xc0] sm:$0xff] }
  0x5b   :  { %872 = vmatpush.bf16.msra.mxu2 %v1636_v48  ;;  %812 = vmatmul.bf16.vlgmr.msrb.gmra.mxu0 %v2407_v2  ;;  %v1812_v48 = vor.u32 %v2051_v43, %v1809_v45  ;;  %v130_v43 = vld [vmem:[#allocation3 + $0xb8] sm:$0xff]  ;;  %v2435_v45 = vpack.c.bf16 %v134_v37, %v129_v36 }
  0x5c   :  { %906 = vmatpush.bf16.msra.mxu3 %v1700_v51  ;;  %940 = vmatpush.bf16.msra.mxu0 %v1764_v59  ;;  %v1737_v51 = vld [vmem:[#allocation6 + $0x1c8] sm:$0xf0]  ;;  %v124_v59 = vld [vmem:[#allocation3 + $0x88] sm:$0xff] }
  0x5d   :  { %730 = vmatmul.bf16.gmra.mxu3 %v2409_v9  ;;  %846 = vmatmul.bf16.vlgmr.msrb.gmra.mxu1 %v2383_v5  ;;  %v109_v5 = vld [vmem:[#allocation3 + $0x10] sm:$0xff]  ;;  %v1740_v53 = vor.u32 %v2033_v50, %v1737_v51  ;;  %v2027_v50 = vld [vmem:[#allocation6 + $0x194] sm:$0xf] }
  0x5e   :  { %974 = vmatpush.bf16.msra.mxu1 %v1828_v14  ;;  %v2415_v38 = vpack.c.bf16 %v114_v33, %v109_v5  ;;  %v1997_v14 = vld [vmem:[#allocation6 + $0xa4] sm:$0xf]  ;;  %v1716_v55 = vor.u32 %v2027_v50, %v1713_v52 }
  0x5f   :  { %873 = vmatpush.bf16.msra.mxu2 %v1628_v12  ;;  %v2427_v12 = vpack.c.bf16 %v136_v61, %v131_v60  ;;  %v1596_v17 = vor.u32 %v1997_v14, %v1593_v15  ;;  %v2045_v5 = vld [vmem:[#allocation6 + $0x224] sm:$0xf]  ;;  %v1705_v60 = vld [vmem:[#allocation6 + $0x188] sm:$0xf0]  ;;  %v151_v14 = vld [vmem:[#allocation3 + $0x160] sm:$0xff] }
  0x60   :  { %907 = vmatpush.bf16.msra.mxu3 %v1692_v13  ;;  %941 = vmatpush.bf16.msra.mxu0 %v1756_v22  ;;  %v2429_v13 = vpack.c.bf16 %v125_v4, %v120_v62  ;;  %v1660_v22 = vor.u32 %v2013_v19, %v1657_v20  ;;  %v1788_v35 = vor.u32 %v2045_v5, %v1785_v34  ;;  %v139_v62 = vld [vmem:[#allocation3 + $0x100] sm:$0xff]  ;;  %v144_v4 = vld [vmem:[#allocation3 + $0x128] sm:$0xff]  ;;  %v2041_v20 = vld [vmem:[#allocation6 + $0x204] sm:$0xf] }
  0x61   :  { %v140_v15 = vld [vmem:[#allocation3 + $0x108] sm:$0xff]  ;;  %v2061_v50 = vld [vmem:[#allocation9 + $0x20] sm:$0xff] }
  0x62   :  { %975 = vmatpush.bf16.msra.mxu1 %v1820_v27  ;;  %v1585_v27 = vld [vmem:[#allocation6 + $0x98] sm:$0xf0] }
  0x63   :  { %874 = vmatpush.bf16.msra.mxu2 %v1620_v18  ;;  %v1729_v18 = vld [vmem:[#allocation6 + $0x1b8] sm:$0xf0]  ;;  %v1588_v30 = vor.u32 %v1995_v25, %v1585_v27  ;;  %v150_v25 = vld [vmem:[#allocation3 + $0x158] sm:$0xff] }
  0x64   :  { %908 = vmatpush.bf16.msra.mxu3 %v1684_v23  ;;  %942 = vmatpush.bf16.msra.mxu0 %v1748_v32  ;;  %v1732_v21 = vor.u32 %v2031_v16, %v1729_v18  ;;  %v2047_v23 = vld [vmem:[#allocation6 + $0x234] sm:$0xf]  ;;  %v145_v16 = vld [vmem:[#allocation3 + $0x130] sm:$0xff] }
  0x65   :  { %v1796_v26 = vor.u32 %v2047_v23, %v1793_v24  ;;  %v2011_v32 = vld [vmem:[#allocation6 + $0x114] sm:$0xf]  ;;  %v2449_v19 = vpack.c.bf16 %v145_v16, %v140_v15  ;;  %v149_v23 = vld [vmem:[#allocation3 + $0x150] sm:$0xff]  ;;  %v154_v24 = vld [vmem:[#allocation3 + $0x178] sm:$0xff] }
  0x66   :  { %976 = vmatpush.bf16.msra.mxu1 %v1812_v48  ;;  %v1993_v48 = vld [vmem:[#allocation6 + $0x84] sm:$0xf]  ;;  %v2455_v27 = vpack.c.bf16 %v154_v24, %v149_v23  ;;  %v2071_v16 = vld [vmem:[#allocation9 + $0x70] sm:$0xff] }
  0x67   :  { %875 = vmatpush.bf16.msra.mxu2 %v1612_v31  ;;  %v1724_v31 = vor.u32 %v2029_v28, %v1721_v29  ;;  %v262_v29 = vld [vmem:[#allocation8] sm:$0x3] }
  0x68   :  { %909 = vmatpush.bf16.msra.mxu3 %v1676_v44  ;;  %943 = vmatpush.bf16.msra.mxu0 %v1740_v53  ;;  %v135_v44 = vld [vmem:[#allocation3 + $0xe0] sm:$0xff]  ;;  %v2009_v53 = vld [vmem:[#allocation6 + $0x104] sm:$0xf] }
  0x69   :  { %v2439_v47 = vpack.c.bf16 %v135_v44, %v130_v43  ;;  %v1644_v56 = vor.u32 %v2009_v53, %v1641_v54  ;;  %v2063_v43 = vld [vmem:[#allocation9 + $0x30] sm:$0xff]  ;;  %v2060_v54 = vld [vmem:[#allocation9 + $0x18] sm:$0xff] }
  0x6a   :  { %744 = vmatmul.bf16.vlgmr.msrb.gmra.mxu2 %v2415_v38  ;;  %977 = vmatpush.bf16.msra.mxu1 %v1804_v58  ;;  %v1777_v58 = vld [vmem:[#allocation6 + $0x218] sm:$0xf0] }
  0x6b   :  { %817 = vmatmul.bf16.gmra.mxu0 %v2417_v39  ;;  %876 = vmatpush.bf16.msra.mxu2 %v1604_v49  ;;  %v1577_v49 = vld [vmem:[#allocation6 + $0x88] sm:$0xf0] }
  0x6c   :  { %910 = vmatpush.bf16.msra.mxu3 %v1668_v57  ;;  %944 = vmatpush.bf16.msra.mxu0 %v1732_v21  ;;  %v1580_v51 = vor.u32 %v1993_v48, %v1577_v49  ;;  %v2043_v57 = vld [vmem:[#allocation6 + $0x214] sm:$0xf]  ;;  %v1769_v21 = vld [vmem:[#allocation6 + $0x208] sm:$0xf0] }
  0x6d   :  { %778 = vmatmul.bf16.vlgmr.msrb.gmra.mxu3 %v2419_v40  ;;  %851 = vmatmul.bf16.gmra.mxu1 %v2395_v1  ;;  %v119_v1 = vld [vmem:[#allocation3 + $0x60] sm:$0xff] }
  0x6e   :  { %v2425_v7 = vpack.c.bf16 %v124_v59, %v119_v1  ;;  %978 = vmatpush.bf16.msra.mxu1 %v1796_v26  ;;  %v2025_v1 = vld [vmem:[#allocation6 + $0x184] sm:$0xf]  ;;  %v1780_v59 = vor.u32 %v2043_v57, %v1777_v58  ;;  %v155_v26 = vld [vmem:[#allocation3 + $0x180] sm:$0xff] }
  0x6f   :  { %877 = vmatpush.bf16.msra.mxu2 %v1596_v17  ;;  %v1708_v61 = vor.u32 %v2025_v1, %v1705_v60  ;;  %v2445_v17 = vpack.c.bf16 %v144_v4, %v139_v62  ;;  %v2457_v28 = vpack.c.bf16 %v155_v26, %v150_v25  ;;  %v2059_v58 = vld [vmem:[#allocation9 + $0x10] sm:$0xff]  ;;  %v2058_v60 = vld [vmem:[#allocation9 + $0x8] sm:$0xff]  ;;  %v2057_v4 = vld [vmem:[#allocation9] sm:$0xff] }
  0x70   :  { %911 = vmatpush.bf16.msra.mxu3 %v1660_v22  ;;  %945 = vmatpush.bf16.msra.mxu0 %v1724_v31  ;;  %v1772_v22 = vor.u32 %v2041_v20, %v1769_v21  ;;  %v2468_v31 = vperm.slane %v262_v29, 0 }
  0x72   :  { %979 = vmatpush.bf16.msra.mxu1 %v1788_v35 }
  0x73   :  { %878 = vmatpush.bf16.msra.mxu2 %v1588_v30 }
  0x74   :  { %946 = vmatpush.bf16.msra.mxu0 %v1716_v55 }
  0x76   :  { %980 = vmatpush.bf16.msra.mxu1 %v1780_v59 }
  0x77   :  { %879 = vmatpush.bf16.msra.mxu2 %v1580_v51 }
  0x78   :  { %947 = vmatpush.bf16.msra.mxu0 %v1708_v61  ;;  %v2072_v61 = vld [vmem:[#allocation9 + $0x78] sm:$0xff] }
  0x7a   :  { %749 = vmatmul.bf16.gmra.mxu2 %v2425_v7  ;;  %981 = vmatpush.bf16.msra.mxu1 %v1772_v22 }
  0x7b   :  { %822 = vmatmul.bf16.gmra.mxu0 %v2427_v12 }
  0x7d   :  { %783 = vmatmul.bf16.gmra.mxu3 %v2429_v13  ;;  %856 = vmatmul.bf16.gmra.mxu1 %v2381_v3  ;;  %v1649_v3 = vld [vmem:[#allocation6 + $0x118] sm:$0xf0] }
  0x7e   :  { %v1652_v33 = vor.u32 %v2011_v32, %v1649_v3 }
  0x80   :  { %912 = vmatpush.bf16.msra.mxu3 %v1652_v33 }
  0x84   :  { %913 = vmatpush.bf16.msra.mxu3 %v1644_v56 }
  0x88   :  { %1204 = vmatpush.bf16.msrb.mxu3 %v2072_v61 }
  0x8a   :  { %754 = vmatmul.bf16.gmra.mxu2 %v2435_v45 }
  0x8b   :  { %827 = vmatmul.bf16.gmra.mxu0 %v2437_v46 }
  0x8c   :  { %1205 = vmatpush.bf16.msrb.mxu3 %v2071_v16 }
  0x8d   :  { %788 = vmatmul.bf16.gmra.mxu3 %v2439_v47  ;;  %861 = vmatmul.bf16.gmra.mxu1 %v2393_v63  ;;  %v156_v63 = vld [vmem:[#allocation3 + $0x188] sm:$0xff] }
  0x8e   :  { %v2447_v18 = vpack.c.bf16 %v156_v63, %v151_v14 }
  0x9a   :  { %759 = vmatmul.bf16.gmra.mxu2 %v2445_v17 }
  0x9b   :  { %832 = vmatmul.bf16.gmra.mxu0 %v2447_v18 }
  0x9d   :  { %793 = vmatmul.bf16.gmra.mxu3 %v2449_v19  ;;  %866 = vmatmul.bf16.gmra.mxu1 %v2405_v0 }
  0xaa   :  { %764 = vmatmul.bf16.gmra.mxu2 %v2455_v27 }
  0xab   :  { %948 = vmatmul.bf16.vlgmr.msra.gmra.mxu0 %v2419_v40 }
  0xad   :  { %798 = vmatmul.bf16.gmra.mxu3 %v2457_v28  ;;  %982 = vmatmul.bf16.vlgmr.msra.gmra.mxu1 %v2407_v2 }
  0xb7   :  { %v2463_v30 = vpop.f32.mrf.mxu0 }
  0xba   :  { %v2465_v0 = vpop.f32.mrf.mxu1  ;;  %880 = vmatmul.bf16.vlgmr.msra.gmra.mxu2 %v2387_v11 }
  0xbb   :  { %953 = vmatmul.bf16.gmra.mxu0 %v2429_v13 }
  0xbd   :  { %914 = vmatmul.bf16.vlgmr.msra.gmra.mxu3 %v2415_v38  ;;  %987 = vmatmul.bf16.gmra.mxu1 %v2417_v39  ;;  %v687_v40 = vpop.f32.mrf.mxu2  ;;  %v2064_v39 = vld [vmem:[#allocation9 + $0x38] sm:$0xff] }
  0xbe   :  { %v688_v32 = vadd.f32 %v687_v40, %v2468_v31  ;;  %v721_v3 = vpop.f32.mrf.mxu3  ;;  %1170 = vmatpush.bf16.msrb.mxu2 %v2064_v39 }
  0xbf   :  { %v2474_v2 = vpop.f32.mrf.mxu0 }
  0xc0   :  { %v2476_v5 = vadd.f32 %v721_v3, %v688_v32  ;;  %v680_v23 = vadd.f32 %v2474_v2, %v2468_v31  ;;  %v2070_v2 = vld [vmem:[#allocation9 + $0x68] sm:$0xff] }
  0xc1   :  { %1206 = vmatpush.bf16.msrb.mxu3 %v2070_v2 }
  0xc2   :  { %v2478_v33 = vpop.f32.mrf.mxu1  ;;  %1171 = vmatpush.bf16.msrb.mxu2 %v2063_v43 }
  0xc3   :  { %v714_v25 = vadd.f32 %v2478_v33, %v680_v23  ;;  %v2067_v23 = vld [vmem:[#allocation9 + $0x50] sm:$0xff] }
  0xc5   :  { %v689_v34 = vpop.f32.mrf.mxu2 }
  0xc6   :  { %v690_v11 = vadd.f32 %v689_v34, %v2468_v31  ;;  %v723_v35 = vpop.f32.mrf.mxu3 }
  0xc8   :  { %v2481_v36 = vpop.f32.mrf.mxu0  ;;  %v2483_v13 = vadd.f32 %v723_v35, %v690_v11 }
  0xca   :  { %v2485_v38 = vpop.f32.mrf.mxu1  ;;  %885 = vmatmul.bf16.gmra.mxu2 %v2399_v10  ;;  %v2062_v10 = vld [vmem:[#allocation9 + $0x28] sm:$0xff] }
  0xcb   :  { %958 = vmatmul.bf16.gmra.mxu0 %v2439_v47  ;;  %1172 = vmatpush.bf16.msrb.mxu2 %v2062_v10 }
  0xcd   :  { %919 = vmatmul.bf16.gmra.mxu3 %v2425_v7  ;;  %992 = vmatmul.bf16.gmra.mxu1 %v2427_v12  ;;  %v692_v37 = vpop.f32.mrf.mxu2  ;;  %v2502_v12 = vperm.slane %v262_v29, 1 }
  0xce   :  { %v693_v41 = vadd.f32 %v692_v37, %v2468_v31  ;;  %v683_v37 = vadd.f32 %v2481_v36, %v2468_v31 }
  0xcf   :  { %1173 = vmatpush.bf16.msrb.mxu2 %v2061_v50 }
  0xd0   :  { %v726_v42 = vpop.f32.mrf.mxu3  ;;  %v2492_v44 = vpop.f32.mrf.mxu0 }
  0xd1   :  { %v2494_v48 = vadd.f32 %v726_v42, %v693_v41 }
  0xd2   :  { %v2496_v49 = vpop.f32.mrf.mxu1 }
  0xd3   :  { %1174 = vmatpush.bf16.msrb.mxu2 %v2060_v54  ;;  %v717_v54 = vadd.f32 %v2485_v38, %v683_v37 }
  0xd5   :  { %v2498_v47 = vpop.f32.mrf.mxu2 }
  0xd7   :  { %1175 = vmatpush.bf16.msrb.mxu2 %v2059_v58  ;;  %v2068_v58 = vld [vmem:[#allocation9 + $0x58] sm:$0xff] }
  0xd8   :  { %v2500_v7 = vpop.f32.mrf.mxu3  ;;  %v2504_v51 = vpop.f32.mrf.mxu0 }
  0xda   :  { %v847_v52 = vpop.f32.mrf.mxu1  ;;  %890 = vmatmul.bf16.gmra.mxu2 %v2385_v8 }
  0xdb   :  { %v2508_v53 = vadd.f32 %v847_v52, %v2502_v12  ;;  %963 = vmatmul.bf16.gmra.mxu0 %v2449_v19  ;;  %1176 = vmatpush.bf16.msrb.mxu2 %v2058_v60 }
  0xdd   :  { %924 = vmatmul.bf16.gmra.mxu3 %v2435_v45  ;;  %997 = vmatmul.bf16.gmra.mxu1 %v2437_v46  ;;  %v697_v55 = vpop.f32.mrf.mxu2 }
  0xde   :  { %v698_v56 = vadd.f32 %v697_v55, %v2468_v31 }
  0xdf   :  { %1177 = vmatpush.bf16.msrb.mxu2 %v2057_v4 }
  0xe0   :  { %v731_v57 = vpop.f32.mrf.mxu3  ;;  %v815_v1 = vpop.f32.mrf.mxu0 }
  0xe1   :  { %v2514_v59 = vadd.f32 %v731_v57, %v698_v56 }
  0xe2   :  { %v2516_v8 = vpop.f32.mrf.mxu1 }
  0xe5   :  { %v699_v62 = vpop.f32.mrf.mxu2 }
  0xe6   :  { %v2519_v45 = vadd.f32 %v699_v62, %v2468_v31 }
  0xe8   :  { %v2521_v46 = vpop.f32.mrf.mxu3  ;;  %v2523_v14 = vpop.f32.mrf.mxu0 }
  0xea   :  { %v852_v63 = vpop.f32.mrf.mxu1  ;;  %895 = vmatmul.bf16.gmra.mxu2 %v2397_v6  ;;  %v678_v6 = vadd.f32 %v2463_v30, %v2468_v31 }
  0xeb   :  { %v2527_v15 = vadd.f32 %v852_v63, %v2502_v12  ;;  %968 = vmatmul.bf16.gmra.mxu0 %v2457_v28 }
  0xed   :  { %929 = vmatmul.bf16.gmra.mxu3 %v2445_v17  ;;  %1002 = vmatmul.bf16.gmra.mxu1 %v2447_v18  ;;  %v745_v19 = vpop.f32.mrf.mxu2  ;;  %v712_v18 = vadd.f32 %v2465_v0, %v678_v6  ;;  %v685_v0 = vadd.f32 %v2492_v44, %v2468_v31 }
  0xef   :  { %v746_v40 = vadd.f32 %v745_v19, %v712_v18  ;;  %v719_v43 = vadd.f32 %v2496_v49, %v685_v0 }
  0xf0   :  { %v779_v20 = vpop.f32.mrf.mxu3  ;;  %v820_v21 = vpop.f32.mrf.mxu0 }
  0xf1   :  { %v780_v34 = vadd.f32 %v779_v20, %v746_v40 }
  0xf2   :  { %v2532_v22 = vpop.f32.mrf.mxu1 }
  0xf5   :  { %v747_v24 = vpop.f32.mrf.mxu2 }
  0xf6   :  { %v748_v28 = vadd.f32 %v747_v24, %v714_v25 }
  0xf8   :  { %v781_v26 = vpop.f32.mrf.mxu3  ;;  %v823_v17 = vpop.f32.mrf.mxu0 }
  0xf9   :  { %v782_v3 = vadd.f32 %v781_v26, %v748_v28 }
  0xfa   :  { %v857_v29 = vpop.f32.mrf.mxu1  ;;  %900 = vmatmul.bf16.gmra.mxu2 %v2409_v9  ;;  %v814_v9 = vadd.f32 %v2504_v51, %v780_v34 }
  0xfb   :  { %v2542_v32 = vadd.f32 %v857_v29, %v2502_v12  ;;  %v816_v35 = vadd.f32 %v815_v1, %v782_v3 }
  0xfc   :  { %v1008_v10 = vmax.f32 %v814_v9, 0.0 }
  0xfd   :  { %934 = vmatmul.bf16.gmra.mxu3 %v2455_v27  ;;  %v750_v30 = vpop.f32.mrf.mxu2  ;;  %v1010_v41 = vmax.f32 %v816_v35, 0.0  ;;  %v2069_v27 = vld [vmem:[#allocation9 + $0x60] sm:$0xff] }
  0xfe   :  { %1207 = vmatpush.bf16.msrb.mxu3 %v2069_v27  ;;  %v751_v44 = vadd.f32 %v750_v30, %v717_v54 }
  0xff   :  { %v1028_v55 = vpack.c.bf16 %v1010_v41, %v1008_v10 }
 0x100   :  { %v784_v11 = vpop.f32.mrf.mxu3  ;;  %v825_v33 = vpop.f32.mrf.mxu0 }
 0x101   :  { %v785_v60 = vadd.f32 %v784_v11, %v751_v44 }
 0x102   :  { %v2545_v39 = vpop.f32.mrf.mxu1  ;;  %1208 = vmatpush.bf16.msrb.mxu3 %v2068_v58  ;;  %v734_v58 = vadd.f32 %v2521_v46, %v2519_v45  ;;  %v850_v45 = vadd.f32 %v2516_v8, %v2502_v12 }
 0x103   :  { %v819_v38 = vadd.f32 %v2523_v14, %v785_v60 }
 0x105   :  { %v752_v42 = vpop.f32.mrf.mxu2  ;;  %v1012_v24 = vmax.f32 %v819_v38, 0.0 }
 0x106   :  { %v753_v56 = vadd.f32 %v752_v42, %v719_v43  ;;  %1209 = vmatpush.bf16.msrb.mxu3 %v2067_v23  ;;  %v2066_v43 = vld [vmem:[#allocation9 + $0x48] sm:$0xff] }
 0x108   :  { %v786_v50 = vpop.f32.mrf.mxu3  ;;  %v828_v52 = vpop.f32.mrf.mxu0 }
 0x109   :  { %v787_v36 = vadd.f32 %v786_v50, %v753_v56 }
 0x10a   :  { %v862_v57 = vpop.f32.mrf.mxu1  ;;  %1178 = vmatmul.bf16.vlgmr.msrb.gmra.mxu2 %v1028_v55  ;;  %1210 = vmatpush.bf16.msrb.mxu3 %v2066_v43 }
 0x10b   :  { %v2555_v51 = vadd.f32 %v862_v57, %v2502_v12  ;;  %v821_v49 = vadd.f32 %v820_v21, %v787_v36  ;;  %v2065_v57 = vld [vmem:[#allocation9 + $0x40] sm:$0xff] }
 0x10d   :  { %v755_v1 = vpop.f32.mrf.mxu2  ;;  %v1014_v19 = vmax.f32 %v821_v49, 0.0 }
 0x10e   :  { %v756_v62 = vadd.f32 %v755_v1, %v2476_v5  ;;  %1211 = vmatpush.bf16.msrb.mxu3 %v2065_v57 }
 0x10f   :  { %v1030_v28 = vpack.c.bf16 %v1014_v19, %v1012_v24 }
 0x110   :  { %v789_v61 = vpop.f32.mrf.mxu3  ;;  %v830_v4 = vpop.f32.mrf.mxu0 }
 0x111   :  { %v790_v20 = vadd.f32 %v789_v61, %v756_v62 }
 0x112   :  { %v864_v63 = vpop.f32.mrf.mxu1 }
 0x113   :  { %v2560_v16 = vadd.f32 %v864_v63, %v2502_v12  ;;  %v824_v18 = vadd.f32 %v823_v17, %v790_v20 }
 0x115   :  { %v757_v6 = vpop.f32.mrf.mxu2  ;;  %v1016_v3 = vmax.f32 %v824_v18, 0.0 }
 0x116   :  { %v758_v25 = vadd.f32 %v757_v6, %v2483_v13  ;;  %v695_v13 = vadd.f32 %v2498_v47, %v2468_v31 }
 0x118   :  { %v791_v26 = vpop.f32.mrf.mxu3  ;;  %v833_v40 = vpop.f32.mrf.mxu0 }
 0x119   :  { %v792_v21 = vadd.f32 %v791_v26, %v758_v25 }
 0x11a   :  { %v867_v5 = vpop.f32.mrf.mxu1  ;;  %1183 = vmatmul.bf16.gmra.mxu2 %v1030_v28 }
 0x11b   :  { %v826_v29 = vadd.f32 %v825_v33, %v792_v21  ;;  %v2564_v14 = vadd.f32 %v867_v5, %v2502_v12  ;;  %v729_v33 = vadd.f32 %v2500_v7, %v695_v13 }
 0x11d   :  { %v1018_v2 = vmax.f32 %v826_v29, 0.0  ;;  %v760_v30 = vpop.f32.mrf.mxu2 }
 0x11e   :  { %v761_v35 = vadd.f32 %v760_v30, %v2494_v48 }
 0x11f   :  { %v1032_v11 = vpack.c.bf16 %v1018_v2, %v1016_v3 }
 0x120   :  { %v794_v34 = vpop.f32.mrf.mxu3  ;;  %v835_v41 = vpop.f32.mrf.mxu0 }
 0x121   :  { %v795_v9 = vadd.f32 %v794_v34, %v761_v35 }
 0x122   :  { %v869_v17 = vpop.f32.mrf.mxu1 }
 0x123   :  { %v2570_v0 = vadd.f32 %v869_v17, %v2502_v12  ;;  %v829_v10 = vadd.f32 %v828_v52, %v795_v9  ;;  %v855_v9 = vadd.f32 %v2532_v22, %v2502_v12 }
 0x125   :  { %v762_v37 = vpop.f32.mrf.mxu2  ;;  %v1020_v31 = vmax.f32 %v829_v10, 0.0 }
 0x126   :  { %v763_v27 = vadd.f32 %v762_v37, %v729_v33 }
 0x128   :  { %v796_v42 = vpop.f32.mrf.mxu3  ;;  %v949_v44 = vpop.f32.mrf.mxu0 }
 0x129   :  { %v797_v50 = vadd.f32 %v796_v42, %v763_v27 }
 0x12a   :  { %1188 = vmatmul.bf16.gmra.mxu2 %v1032_v11  ;;  %v983_v36 = vpop.f32.mrf.mxu1 }
 0x12b   :  { %v831_v54 = vadd.f32 %v830_v4, %v797_v50 }
 0x12d   :  { %v1022_v47 = vmax.f32 %v831_v54, 0.0  ;;  %v765_v48 = vpop.f32.mrf.mxu2 }
 0x12e   :  { %v766_v7 = vadd.f32 %v765_v48, %v2514_v59 }
 0x12f   :  { %v1034_v56 = vpack.c.bf16 %v1022_v47, %v1020_v31 }
 0x130   :  { %v799_v55 = vpop.f32.mrf.mxu3  ;;  %v951_v4 = vpop.f32.mrf.mxu0 }
 0x131   :  { %v800_v1 = vadd.f32 %v799_v55, %v766_v7 }
 0x132   :  { %v985_v38 = vpop.f32.mrf.mxu1 }
 0x133   :  { %v834_v49 = vadd.f32 %v833_v40, %v800_v1 }
 0x135   :  { %v767_v52 = vpop.f32.mrf.mxu2  ;;  %v1024_v19 = vmax.f32 %v834_v49, 0.0 }
 0x136   :  { %v768_v60 = vadd.f32 %v767_v52, %v734_v58  ;;  %v860_v58 = vadd.f32 %v2545_v39, %v2502_v12 }
 0x138   :  { %v801_v61 = vpop.f32.mrf.mxu3  ;;  %v954_v26 = vpop.f32.mrf.mxu0 }
 0x139   :  { %v802_v62 = vadd.f32 %v801_v61, %v768_v60 }
 0x13a   :  { %1193 = vmatmul.bf16.gmra.mxu2 %v1034_v56  ;;  %v988_v18 = vpop.f32.mrf.mxu1 }
 0x13b   :  { %v836_v63 = vadd.f32 %v835_v41, %v802_v62 }
 0x13d   :  { %v1026_v20 = vmax.f32 %v836_v63, 0.0  ;;  %v881_v23 = vpop.f32.mrf.mxu2 }
 0x13e   :  { %v882_v59 = vadd.f32 %v881_v23, %v2508_v53 }
 0x13f   :  { %v1036_v24 = vpack.c.bf16 %v1026_v20, %v1024_v19 }
 0x140   :  { %v915_v6 = vpop.f32.mrf.mxu3  ;;  %v956_v34 = vpop.f32.mrf.mxu0 }
 0x141   :  { %v916_v25 = vadd.f32 %v915_v6, %v882_v59 }
 0x142   :  { %v990_v17 = vpop.f32.mrf.mxu1 }
 0x143   :  { %v950_v21 = vadd.f32 %v949_v44, %v916_v25 }
 0x145   :  { %v883_v46 = vpop.f32.mrf.mxu2  ;;  %v984_v40 = vadd.f32 %v983_v36, %v950_v21  ;;  %v2093_v21 = vld [vmem:[#allocation11 + $0x74] sm:$0xf0] }
 0x146   :  { %v884_v28 = vadd.f32 %v883_v46, %v850_v45 }
 0x147   :  { %v1009_v53 = vmax.f32 %v984_v40, 0.0  ;;  %v1973_v40 = vld [vmem:[#allocation11 + $0x78] sm:$0xf0] }
 0x148   :  { %v917_v5 = vpop.f32.mrf.mxu3  ;;  %v959_v43 = vpop.f32.mrf.mxu0 }
 0x149   :  { %v918_v29 = vadd.f32 %v917_v5, %v884_v28 }
 0x14a   :  { %1198 = vmatmul.bf16.gmra.mxu2 %v1036_v24  ;;  %v993_v50 = vpop.f32.mrf.mxu1 }
 0x14b   :  { %v952_v3 = vadd.f32 %v951_v4, %v918_v29  ;;  %v2092_v29 = vld [vmem:[#allocation11 + $0x74] sm:$0xf] }
 0x14d   :  { %v986_v2 = vadd.f32 %v985_v38, %v952_v3  ;;  %v886_v30 = vpop.f32.mrf.mxu2 }
 0x14e   :  { %v887_v13 = vadd.f32 %v886_v30, %v2527_v15 }
 0x14f   :  { %v1011_v11 = vmax.f32 %v986_v2, 0.0  ;;  %v1976_v2 = vor.u32 %v2092_v29, %v1973_v40 }
 0x150   :  { %v920_v35 = vpop.f32.mrf.mxu3  ;;  %v961_v7 = vpop.f32.mrf.mxu0 }
 0x151   :  { %v1029_v33 = vpack.c.bf16 %v1011_v11, %v1009_v53  ;;  %v921_v8 = vadd.f32 %v920_v35, %v887_v13  ;;  %1434 = vmatpush.bf16.msrb.mxu1 %v1976_v2  ;;  %v2079_v2 = vld [vmem:[#allocation11 + $0x4] sm:$0xf0] }
 0x152   :  { %v995_v22 = vpop.f32.mrf.mxu1 }
 0x153   :  { %1212 = vmatmul.bf16.vlgmr.msrb.gmra.mxu3 %v1029_v33  ;;  %v955_v41 = vadd.f32 %v954_v26, %v921_v8 }
 0x155   :  { %v888_v37 = vpop.f32.mrf.mxu2  ;;  %v989_v54 = vadd.f32 %v988_v18, %v955_v41  ;;  %v1971_v18 = vld [vmem:[#allocation11 + $0x70] sm:$0xf] }
 0x156   :  { %v889_v27 = vadd.f32 %v888_v37, %v855_v9  ;;  %v1972_v5 = vor.u32 %v2093_v21, %v1971_v18  ;;  %v2081_v18 = vld [vmem:[#allocation11 + $0x14] sm:$0xf0]  ;;  %v2080_v21 = vld [vmem:[#allocation11 + $0x14] sm:$0xf] }
 0x157   :  { %v1013_v15 = vmax.f32 %v989_v54, 0.0  ;;  %v2090_v54 = vld [vmem:[#allocation11 + $0x64] sm:$0xf] }
 0x158   :  { %v922_v42 = vpop.f32.mrf.mxu3  ;;  %v964_v63 = vpop.f32.mrf.mxu0  ;;  %1400 = vmatpush.bf16.msrb.mxu0 %v1972_v5  ;;  %v1925_v5 = vld [vmem:[#allocation11 + $0x18] sm:$0xf0] }
 0x159   :  { %v923_v10 = vadd.f32 %v922_v42, %v889_v27  ;;  %v1963_v42 = vld [vmem:[#allocation11 + $0x60] sm:$0xf]  ;;  %v1928_v29 = vor.u32 %v2080_v21, %v1925_v5 }
 0x15a   :  { %v998_v19 = vpop.f32.mrf.mxu1 }
 0x15b   :  { %v957_v31 = vadd.f32 %v956_v34, %v923_v10 }
 0x15d   :  { %v991_v47 = vadd.f32 %v990_v17, %v957_v31  ;;  %v891_v48 = vpop.f32.mrf.mxu2  ;;  %v1965_v31 = vld [vmem:[#allocation11 + $0x68] sm:$0xf0] }
 0x15e   :  { %v892_v56 = vadd.f32 %v891_v48, %v2542_v32  ;;  %v1968_v48 = vor.u32 %v2090_v54, %v1965_v31 }
 0x15f   :  { %v1015_v55 = vmax.f32 %v991_v47, 0.0 }
 0x160   :  { %v925_v57 = vpop.f32.mrf.mxu3  ;;  %v966_v12 = vpop.f32.mrf.mxu0  ;;  %1435 = vmatpush.bf16.msrb.mxu1 %v1968_v48 }
 0x161   :  { %v1031_v44 = vpack.c.bf16 %v1015_v55, %v1013_v15  ;;  %v926_v36 = vadd.f32 %v925_v57, %v892_v56 }
 0x162   :  { %v1000_v28 = vpop.f32.mrf.mxu1 }
 0x163   :  { %1217 = vmatmul.bf16.gmra.mxu3 %v1031_v44  ;;  %v960_v52 = vadd.f32 %v959_v43, %v926_v36  ;;  %v2091_v43 = vld [vmem:[#allocation11 + $0x64] sm:$0xf0]  ;;  %v1955_v36 = vld [vmem:[#allocation11 + $0x50] sm:$0xf] }
 0x165   :  { %v893_v1 = vpop.f32.mrf.mxu2  ;;  %v994_v62 = vadd.f32 %v993_v50, %v960_v52  ;;  %v1964_v50 = vor.u32 %v2091_v43, %v1963_v42 }
 0x166   :  { %v894_v60 = vadd.f32 %v893_v1, %v860_v58  ;;  %v2088_v58 = vld [vmem:[#allocation11 + $0x54] sm:$0xf]  ;;  %v1957_v1 = vld [vmem:[#allocation11 + $0x58] sm:$0xf0] }
 0x167   :  { %v1017_v20 = vmax.f32 %v994_v62, 0.0  ;;  %1401 = vmatpush.bf16.msrb.mxu0 %v1964_v50  ;;  %v2086_v62 = vld [vmem:[#allocation11 + $0x44] sm:$0xf] }
 0x168   :  { %v927_v61 = vpop.f32.mrf.mxu3  ;;  %v969_v17 = vpop.f32.mrf.mxu0 }
 0x169   :  { %v928_v49 = vadd.f32 %v927_v61, %v894_v60  ;;  %v1960_v60 = vor.u32 %v2088_v58, %v1957_v1  ;;  %v1947_v61 = vld [vmem:[#allocation11 + $0x40] sm:$0xf] }
 0x16a   :  { %v1003_v8 = vpop.f32.mrf.mxu1 }
 0x16b   :  { %v962_v4 = vadd.f32 %v961_v7, %v928_v49  ;;  %1436 = vmatpush.bf16.msrb.mxu1 %v1960_v60  ;;  %v2087_v49 = vld [vmem:[#allocation11 + $0x44] sm:$0xf0] }
 0x16d   :  { %v996_v38 = vadd.f32 %v995_v22, %v962_v4  ;;  %v896_v32 = vpop.f32.mrf.mxu2  ;;  %v2089_v22 = vld [vmem:[#allocation11 + $0x54] sm:$0xf0]  ;;  %v1948_v4 = vor.u32 %v2087_v49, %v1947_v61 }
 0x16e   :  { %v897_v59 = vadd.f32 %v896_v32, %v2555_v51  ;;  %v2085_v32 = vld [vmem:[#allocation11 + $0x34] sm:$0xf0] }
 0x16f   :  { %v1019_v23 = vmax.f32 %v996_v38, 0.0 }
 0x170   :  { %v930_v6 = vpop.f32.mrf.mxu3  ;;  %v971_v15 = vpop.f32.mrf.mxu0 }
 0x171   :  { %v1033_v24 = vpack.c.bf16 %v1019_v23, %v1017_v20  ;;  %v931_v25 = vadd.f32 %v930_v6, %v897_v59  ;;  %v2084_v20 = vld [vmem:[#allocation11 + $0x34] sm:$0xf]  ;;  %v1941_v59 = vld [vmem:[#allocation11 + $0x38] sm:$0xf0] }
 0x172   :  { %v1005_v56 = vpop.f32.mrf.mxu1  ;;  %v1944_v6 = vor.u32 %v2084_v20, %v1941_v59 }
 0x173   :  { %1222 = vmatmul.bf16.gmra.mxu3 %v1033_v24  ;;  %v965_v26 = vadd.f32 %v964_v63, %v931_v25  ;;  %v1949_v63 = vld [vmem:[#allocation11 + $0x48] sm:$0xf0]  ;;  %v1931_v24 = vld [vmem:[#allocation11 + $0x20] sm:$0xf]  ;;  %v2083_v25 = vld [vmem:[#allocation11 + $0x24] sm:$0xf0] }
 0x174   :  { %v1952_v38 = vor.u32 %v2086_v62, %v1949_v63 }
 0x175   :  { %v898_v39 = vpop.f32.mrf.mxu2  ;;  %v999_v51 = vadd.f32 %v998_v19, %v965_v26  ;;  %v1939_v19 = vld [vmem:[#allocation11 + $0x30] sm:$0xf]  ;;  %v1933_v26 = vld [vmem:[#allocation11 + $0x28] sm:$0xf0] }
 0x176   :  { %v899_v45 = vadd.f32 %v898_v39, %v2560_v16  ;;  %1437 = vmatpush.bf16.msrb.mxu1 %v1952_v38  ;;  %v1940_v23 = vor.u32 %v2085_v32, %v1939_v19  ;;  %v1932_v39 = vor.u32 %v2083_v25, %v1931_v24 }
 0x177   :  { %v1021_v11 = vmax.f32 %v999_v51, 0.0  ;;  %v2078_v51 = vld [vmem:[#allocation11 + $0x4] sm:$0xf] }
 0x178   :  { %v932_v46 = vpop.f32.mrf.mxu3 }
 0x179   :  { %v933_v3 = vadd.f32 %v932_v46, %v899_v45  ;;  %v1923_v46 = vld [vmem:[#allocation11 + $0x10] sm:$0xf] }
 0x17a   :  { %1438 = vmatpush.bf16.msrb.mxu1 %v1944_v6 }
 0x17b   :  { %v967_v30 = vadd.f32 %v966_v12, %v933_v3  ;;  %v2082_v12 = vld [vmem:[#allocation11 + $0x24] sm:$0xf]  ;;  %v1915_v3 = vld [vmem:[#allocation11] sm:$0xf] }
 0x17c   :  { %v1936_v45 = vor.u32 %v2082_v12, %v1933_v26 }
 0x17d   :  { %v1001_v34 = vadd.f32 %v1000_v28, %v967_v30  ;;  %v901_v53 = vpop.f32.mrf.mxu2  ;;  %v1924_v28 = vor.u32 %v2081_v18, %v1923_v46  ;;  %v1916_v30 = vor.u32 %v2079_v2, %v1915_v3 }
 0x17e   :  { %v902_v35 = vadd.f32 %v901_v53, %v2564_v14  ;;  %1439 = vmatpush.bf16.msrb.mxu1 %v1936_v45  ;;  %v1284_v45 = vld [vmem:[%s2604_s6] sm:$0x3]  ;;  %s2317_s6 = smov [#allocation12]  }
 0x17f   :  { %v1023_v13 = vmax.f32 %v1001_v34, 0.0  ;;  %v1917_v34 = vld [vmem:[#allocation11 + $0x8] sm:$0xf0]  ;;  %v1286_v46 = vperm.slane %v1284_v45, 0  ;;  %v1287_v18 = vperm.slane %v1284_v45, 1  ;;  %s1492_s30 = sshll.u32 %s2317_s6, 4  ;;  %s1493_s30 = int_to_ptr.vmem [resolvable:$true] %s1492_s30 }
 0x180   :  { %v935_v16 = vpop.f32.mrf.mxu3  ;;  %v1920_v53 = vor.u32 %v2078_v51, %v1917_v34 }
 0x181   :  { %v1035_v33 = vpack.c.bf16 %v1023_v13, %v1021_v11  ;;  %v936_v9 = vadd.f32 %v935_v16, %v902_v35  ;;  %v2153_v16 = vld [vmem:[%s2602_s4] ss:$0 sm:$0xff] }
 0x182   :  { %1440 = vmatpush.bf16.msrb.mxu1 %v1928_v29 }
 0x183   :  { %1227 = vmatmul.bf16.gmra.mxu3 %v1035_v33  ;;  %v970_v41 = vadd.f32 %v969_v17, %v936_v9 }
 0x185   :  { %v903_v37 = vpop.f32.mrf.mxu2  ;;  %v1004_v14 = vadd.f32 %v1003_v8, %v970_v41 }
 0x186   :  { %v904_v27 = vadd.f32 %v903_v37, %v2570_v0  ;;  %v1956_v0 = vor.u32 %v2089_v22, %v1955_v36  ;;  %1441 = vmatpush.bf16.msrb.mxu1 %v1920_v53 }
 0x187   :  { %v1025_v44 = vmax.f32 %v1004_v14, 0.0 }
 0x188   :  { %v937_v10 = vpop.f32.mrf.mxu3  ;;  %1402 = vmatpush.bf16.msrb.mxu0 %v1956_v0 }
 0x189   :  { %v938_v47 = vadd.f32 %v937_v10, %v904_v27 }
 0x18b   :  { %v972_v55 = vadd.f32 %v971_v15, %v938_v47 }
 0x18c   :  { %1403 = vmatpush.bf16.msrb.mxu0 %v1948_v4 }
 0x18d   :  { %v1006_v57 = vadd.f32 %v1005_v56, %v972_v55  ;;  %v1179_v40 = vpop.f32.mrf.mxu2 }
 0x18e   :  { %v1180_v17 = vadd.f32 %v2153_v16, %v1179_v40 }
 0x18f   :  { %v1027_v7 = vmax.f32 %v1006_v57, 0.0 }
 0x190   :  { %1404 = vmatpush.bf16.msrb.mxu0 %v1940_v23 }
 0x191   :  { %v1037_v52 = vpack.c.bf16 %v1027_v7, %v1025_v44 }
 0x193   :  { %1232 = vmatmul.bf16.gmra.mxu3 %v1037_v52 }
 0x194   :  { %1405 = vmatpush.bf16.msrb.mxu0 %v1932_v39 }
 0x195   :  { %v1181_v11 = vpop.f32.mrf.mxu2 }
 0x196   :  { %v1182_v33 = vadd.f32 %v2153_v16, %v1181_v11 }
 0x198   :  { %1406 = vmatpush.bf16.msrb.mxu0 %v1924_v28 }
 0x19c   :  { %1407 = vmatpush.bf16.msrb.mxu0 %v1916_v30 }
 0x19d   :  { %v1184_v13 = vpop.f32.mrf.mxu2 }
 0x19e   :  { %v1185_v50 = vadd.f32 %v2153_v16, %v1184_v13 }
 0x1a5   :  { %v1186_v8 = vpop.f32.mrf.mxu2 }
 0x1a6   :  { %v1187_v54 = vadd.f32 %v2153_v16, %v1186_v8 }
 0x1ad   :  { %v1189_v43 = vpop.f32.mrf.mxu2 }
 0x1ae   :  { %v1190_v44 = vadd.f32 %v2153_v16, %v1189_v43 }
 0x1b5   :  { %v1191_v14 = vpop.f32.mrf.mxu2 }
 0x1b6   :  { %v1192_v7 = vadd.f32 %v2153_v16, %v1191_v14 }
 0x1bd   :  { %v1194_v57 = vpop.f32.mrf.mxu2 }
 0x1be   :  { %v1195_v61 = vadd.f32 %v2153_v16, %v1194_v57 }
 0x1c5   :  { %v1196_v1 = vpop.f32.mrf.mxu2 }
 0x1c6   :  { %v1197_v49 = vadd.f32 %v2153_v16, %v1196_v1 }
 0x1cd   :  { %v1199_v38 = vpop.f32.mrf.mxu2 }
 0x1ce   :  { %v1200_v59 = vadd.f32 %v2153_v16, %v1199_v38 }
 0x1d5   :  { %v1201_v20 = vpop.f32.mrf.mxu2 }
 0x1d6   :  { %v1213_v35 = vpop.f32.mrf.mxu3  ;;  %v1202_v6 = vadd.f32 %v2153_v16, %v1201_v20 }
 0x1d7   :  { %v1214_v37 = vadd.f32 %v1213_v35, %v1180_v17 }
 0x1de   :  { %v1215_v9 = vpop.f32.mrf.mxu3 }
 0x1df   :  { %v1216_v41 = vadd.f32 %v1215_v9, %v1182_v33 }
 0x1e1   :  { %v2097_v27 = vpack.c.bf16 %v1216_v41, %v1214_v37 }
 0x1e3   :  { %2098 = vst [vmem:[#allocation2 + $0x8] sm:$0xff] %v2097_v27  }
 0x1e6   :  { %v1218_v42 = vpop.f32.mrf.mxu3 }
 0x1e7   :  { %v1219_v47 = vadd.f32 %v1218_v42, %v1185_v50 }
 0x1ea   :  { %v2073_v10 = vld [vmem:[#allocation2 + $0x8] sm:$0xff] }
 0x1eb   :  { %1408 = vmatmul.bf16.vlgmr.msrb.gmra.mxu0 %v2073_v10  ;;  %1442 = vmatmul.bf16.vlgmr.msrb.gmra.mxu1 %v2073_v10 }
 0x1ee   :  { %v1220_v31 = vpop.f32.mrf.mxu3 }
 0x1ef   :  { %v1221_v48 = vadd.f32 %v1220_v31, %v1187_v54 }
 0x1f1   :  { %v2102_v15 = vpack.c.bf16 %v1221_v48, %v1219_v47 }
 0x1f3   :  { %2119 = vst [vmem:[#allocation2] sm:$0xff] %v2102_v15  }
 0x1f6   :  { %v1223_v55 = vpop.f32.mrf.mxu3 }
 0x1f7   :  { %v1224_v22 = vadd.f32 %v1223_v55, %v1190_v44 }
 0x1fa   :  { %v2074_v56 = vld [vmem:[#allocation2] sm:$0xff] }
 0x1fb   :  { %1413 = vmatmul.bf16.gmra.mxu0 %v2074_v56  ;;  %1447 = vmatmul.bf16.gmra.mxu1 %v2074_v56 }
 0x1fe   :  { %v1225_v36 = vpop.f32.mrf.mxu3 }
 0x1ff   :  { %v1226_v0 = vadd.f32 %v1225_v36, %v1192_v7 }
 0x201   :  { %v2107_v58 = vpack.c.bf16 %v1226_v0, %v1224_v22 }
 0x203   :  { %2120 = vst [vmem:[#allocation2 + $0x20] sm:$0xff] %v2107_v58  }
 0x206   :  { %v1228_v52 = vpop.f32.mrf.mxu3 }
 0x207   :  { %v1229_v4 = vadd.f32 %v1228_v52, %v1195_v61 }
 0x20a   :  { %v2075_v60 = vld [vmem:[#allocation2 + $0x20] sm:$0xff] }
 0x20b   :  { %1418 = vmatmul.bf16.gmra.mxu0 %v2075_v60  ;;  %1452 = vmatmul.bf16.gmra.mxu1 %v2075_v60 }
 0x20e   :  { %v1230_v62 = vpop.f32.mrf.mxu3 }
 0x20f   :  { %v1231_v63 = vadd.f32 %v1230_v62, %v1197_v49 }
 0x211   :  { %v2112_v19 = vpack.c.bf16 %v1231_v63, %v1229_v4 }
 0x213   :  { %2121 = vst [vmem:[#allocation2 + $0x10] sm:$0xff] %v2112_v19  }
 0x216   :  { %v1233_v32 = vpop.f32.mrf.mxu3 }
 0x217   :  { %v1234_v25 = vadd.f32 %v1233_v32, %v1200_v59 }
 0x21a   :  { %v2076_v23 = vld [vmem:[#allocation2 + $0x10] sm:$0xff] }
 0x21b   :  { %1423 = vmatmul.bf16.gmra.mxu0 %v2076_v23  ;;  %1457 = vmatmul.bf16.gmra.mxu1 %v2076_v23 }
 0x21e   :  { %v1235_v24 = vpop.f32.mrf.mxu3 }
 0x21f   :  { %v1236_v12 = vadd.f32 %v1235_v24, %v1202_v6 }
 0x221   :  { %v2117_v39 = vpack.c.bf16 %v1236_v12, %v1234_v25 }
 0x223   :  { %2122 = vst [vmem:[#allocation2 + $0x18] sm:$0xff] %v2117_v39  }
 0x22a   :  { %v2077_v26 = vld [vmem:[#allocation2 + $0x18] sm:$0xff] }
 0x22b   :  { %1428 = vmatmul.bf16.gmra.mxu0 %v2077_v26  ;;  %1462 = vmatmul.bf16.gmra.mxu1 %v2077_v26 }
 0x268   :  { %v1409_v21 = vpop.f32.mrf.mxu0  ;;  %v1443_v28 = vpop.f32.mrf.mxu1 }
 0x269   :  { %v1410_v5 = vadd.f32 %v1409_v21, %v1286_v46  ;;  %v1444_v29 = vadd.f32 %v1443_v28, %v1287_v18 }
 0x26b   :  { %1468 = vst [vmem:[#allocation12] sm:$0xff] %v1410_v5 }
 0x26c   :  { %1469 = vst [vmem:[#allocation12 + $0x8] sm:$0xff] %v1444_v29 }
 0x270   :  { %v1411_v40 = vpop.f32.mrf.mxu0  ;;  %v1445_v3 = vpop.f32.mrf.mxu1 }
 0x271   :  { %v1412_v2 = vadd.f32 %v1411_v40, %v1286_v46  ;;  %v1446_v51 = vadd.f32 %v1445_v3, %v1287_v18 }
 0x273   :  { %1470 = vst [vmem:[#allocation12 + $0x10] sm:$0xff] %v1412_v2 }
 0x274   :  { %1471 = vst [vmem:[#allocation12 + $0x18] sm:$0xff] %v1446_v51 }
 0x278   :  { %v1414_v30 = vpop.f32.mrf.mxu0  ;;  %v1448_v34 = vpop.f32.mrf.mxu1 }
 0x279   :  { %v1415_v53 = vadd.f32 %v1414_v30, %v1286_v46  ;;  %v1449_v11 = vadd.f32 %v1448_v34, %v1287_v18 }
 0x27b   :  { %1472 = vst [vmem:[#allocation12 + $0x20] sm:$0xff] %v1415_v53 }
 0x27c   :  { %1473 = vst [vmem:[#allocation12 + $0x28] sm:$0xff] %v1449_v11 }
 0x280   :  { %v1416_v13 = vpop.f32.mrf.mxu0  ;;  %v1450_v35 = vpop.f32.mrf.mxu1 }
 0x281   :  { %v1417_v16 = vadd.f32 %v1416_v13, %v1286_v46  ;;  %v1451_v17 = vadd.f32 %v1450_v35, %v1287_v18 }
 0x283   :  { %1474 = vst [vmem:[#allocation12 + $0x30] sm:$0xff] %v1417_v16 }
 0x284   :  { %1475 = vst [vmem:[#allocation12 + $0x38] sm:$0xff] %v1451_v17 }
 0x288   :  { %v1419_v33 = vpop.f32.mrf.mxu0  ;;  %v1453_v8 = vpop.f32.mrf.mxu1 }
 0x289   :  { %v1420_v9 = vadd.f32 %v1419_v33, %v1286_v46  ;;  %v1454_v37 = vadd.f32 %v1453_v8, %v1287_v18 }
 0x28b   :  { %1476 = vst [vmem:[#allocation12 + $0x40] sm:$0xff] %v1420_v9 }
 0x28c   :  { %1477 = vst [vmem:[#allocation12 + $0x48] sm:$0xff] %v1454_v37 }
 0x290   :  { %v1421_v41 = vpop.f32.mrf.mxu0  ;;  %v1455_v27 = vpop.f32.mrf.mxu1 }
 0x291   :  { %v1422_v42 = vadd.f32 %v1421_v41, %v1286_v46  ;;  %v1456_v43 = vadd.f32 %v1455_v27, %v1287_v18 }
 0x293   :  { %1478 = vst [vmem:[#allocation12 + $0x50] sm:$0xff] %v1422_v42 }
 0x294   :  { %1479 = vst [vmem:[#allocation12 + $0x58] sm:$0xff] %v1456_v43 }
 0x298   :  { %v1424_v10 = vpop.f32.mrf.mxu0  ;;  %v1458_v50 = vpop.f32.mrf.mxu1 }
 0x299   :  { %v1425_v54 = vadd.f32 %v1424_v10, %v1286_v46  ;;  %v1459_v31 = vadd.f32 %v1458_v50, %v1287_v18 }
 0x29b   :  { %1480 = vst [vmem:[#allocation12 + $0x60] sm:$0xff] %v1425_v54 }
 0x29c   :  { %1481 = vst [vmem:[#allocation12 + $0x68] sm:$0xff] %v1459_v31 }
 0x2a0   :  { %v1426_v47 = vpop.f32.mrf.mxu0  ;;  %v1460_v48 = vpop.f32.mrf.mxu1 }
 0x2a1   :  { %v1427_v15 = vadd.f32 %v1426_v47, %v1286_v46  ;;  %v1461_v14 = vadd.f32 %v1460_v48, %v1287_v18 }
 0x2a3   :  { %1482 = vst [vmem:[#allocation12 + $0x70] sm:$0xff] %v1427_v15 }
 0x2a4   :  { %1483 = vst [vmem:[#allocation12 + $0x78] sm:$0xff] %v1461_v14 }
 0x2a8   :  { %v1429_v55 = vpop.f32.mrf.mxu0  ;;  %v1463_v56 = vpop.f32.mrf.mxu1 }
 0x2a9   :  { %v1430_v57 = vadd.f32 %v1429_v55, %v1286_v46  ;;  %v1464_v44 = vadd.f32 %v1463_v56, %v1287_v18 }
 0x2ab   :  { %1484 = vst [vmem:[#allocation12 + $0x80] sm:$0xff] %v1430_v57 }
 0x2ac   :  { %1485 = vst [vmem:[#allocation12 + $0x88] sm:$0xff] %v1464_v44 }
 0x2b0   :  { %v1431_v7 = vpop.f32.mrf.mxu0  ;;  %v1465_v36 = vpop.f32.mrf.mxu1 }
 0x2b1   :  { %v1432_v22 = vadd.f32 %v1431_v7, %v1286_v46  ;;  %v1466_v0 = vadd.f32 %v1465_v36, %v1287_v18 }
 0x2b3   :  { %1486 = vst [vmem:[#allocation12 + $0x90] sm:$0xff] %v1432_v22 }
 0x2b4   :  { %1487 = vst [vmem:[#allocation12 + $0x98] sm:$0xff] %v1466_v0 }
 0x2b5   :  { %1500 = dma.vmem_to_hbm [thread:$0]  %s1493_s30, 2560, %s1495_s10, [#allocation5], %s2318_s11, %s2318_s11, %s2319_s12  }
 0x2b6   :  { %2304 = dma.done.wait [#allocation5], 2560  }
 0x2b7   :  { %2305 = vsyncadd [#allocation5], 4294964736 }
 0x2b8   :  { %1505 = vsyncpa [#allocation4], 1 }
 0x2b9   :  { %1506 = vsyncpa [#allocation7], 1 }
 0x2ba   :  { %1507 = vsyncpa [#allocation10], 1 }
 0x2bb   :  { %1508 = vsyncpa [#allocation5], 1 }

</bundles_post_ra>
